<compile_context>
chip_gen: v5e
topology: v5e:2x2
jax: 0.10.0
libtpu: 0.0.40
codegen_flags: <defaults>
</compile_context>

<pallas_src>
import jax
import jax.numpy as jnp
from jax.experimental import pallas as pl
from jax.experimental.pallas import tpu as pltpu

_EPS = 1e-12
_VMEM_BUDGET_BYTES = 40 * 1024 * 1024    # conservative: fits v7x 64 MiB/TC
_VMEM_LIMIT_CAP = 64 * 1024 * 1024
_SMALL_PROBLEM_ELEMS = 1 << 18           # B*D*H below this -> plain XLA path


def _round_up(x, m):
    return ((x + m - 1) // m) * m


# ---------------------------------------------------------------------------
# Kernel 1: TorchLayer.forward — batched surrogate qnode (matmul + L2 norm)
# ---------------------------------------------------------------------------
def _qnode_l2norm_kernel(x_ref, w_ref, o_ref):
    # x_ref: (TB, D) row tile; w_ref: (D, Hp) full (padded) weights; o_ref: (TB, Hp).
    y = jnp.dot(x_ref[...], w_ref[...], preferred_element_type=jnp.float32)
    inv = jax.lax.rsqrt(jnp.sum(y * y, axis=-1, keepdims=True) + _EPS)
    o_ref[...] = (y * inv).astype(o_ref.dtype)


def torch_layer_forward(inputs, weights, *, tile_b=256,
                        compute_dtype=jnp.bfloat16, force_pallas=False):
    """Equivalent of TorchLayer.forward for batched `inputs` (l2_norm surrogate).

    inputs:  (..., D) — any number of leading batch dims (flattened here).
    weights: (D, H)
    returns: (..., H) with the dtype of `inputs`.
    """
    D, H = weights.shape
    assert inputs.shape[-1] == D, (inputs.shape, weights.shape)
    batch_shape = inputs.shape[:-1]
    out_dtype = inputs.dtype

    x2d = inputs.reshape((-1, D))
    B = x2d.shape[0]

    # Small-problem short-circuit: launch overhead dwarfs the work.
    if (not force_pallas) and (B * D * H < _SMALL_PROBLEM_ELEMS):
        y = jnp.dot(x2d.astype(compute_dtype), weights.astype(compute_dtype),
                    preferred_element_type=jnp.float32)
        inv = jax.lax.rsqrt(jnp.sum(y * y, axis=-1, keepdims=True) + _EPS)
        return (y * inv).astype(out_dtype).reshape(batch_shape + (H,))

    # Lane-dense output: pad H to a multiple of 128 (zero columns are
    # norm-neutral), slice back after the kernel.
    Hp = _round_up(H, 128)
    wp = weights.astype(compute_dtype)
    if Hp != H:
        wp = jnp.pad(wp, ((0, 0), (0, Hp - H)))
    xc = x2d.astype(compute_dtype)

    in_b = jnp.dtype(compute_dtype).itemsize
    out_b = jnp.dtype(out_dtype).itemsize

    tb = max(8, min(int(tile_b), _round_up(B, 8)))
    tb = _round_up(tb, 8)

    def _vmem_estimate(t):
        return (2 * t * D * in_b        # double-buffered x tiles
                + 2 * D * Hp * in_b     # weight block (<=2 buffers)
                + 2 * t * Hp * out_b    # double-buffered output tiles
                + t * Hp * 4)           # f32 matmul result

    while _vmem_estimate(tb) > _VMEM_BUDGET_BYTES and tb > 8:
        tb = max(8, (tb // 16) * 8)

    vmem_limit = int(min(_VMEM_LIMIT_CAP,
                         max(16 * 1024 * 1024,
                             2 * _vmem_estimate(tb) + (4 << 20))))

    grid = (pl.cdiv(B, tb),)            # ragged tail block is masked on write

    def _run(single_buffer_weights):
        w_kwargs = {}
        if single_buffer_weights:
            # Weight block never changes (constant index_map) -> one buffer.
            w_kwargs["pipeline_mode"] = pl.Buffered(1)
        in_specs = [
            pl.BlockSpec((tb, D), lambda i: (i, 0)),
            pl.BlockSpec((D, Hp), lambda i: (0, 0), **w_kwargs),
        ]
        return pl.pallas_call(
            _qnode_l2norm_kernel,
            out_shape=jax.ShapeDtypeStruct((B, Hp), out_dtype),
            grid_spec=pltpu.PrefetchScalarGridSpec(
                num_scalar_prefetch=0,
                grid=grid,
                in_specs=in_specs,
                out_specs=pl.BlockSpec((tb, Hp), lambda i: (i, 0)),
            ),
            compiler_params=pltpu.CompilerParams(
                dimension_semantics=("parallel",),
                vmem_limit_bytes=vmem_limit,
            ),
        )(xc, wp)

    try:
        out = _run(True)
    except Exception:
        # Fallback if single-buffer pipeline_mode is unsupported.
        out = _run(False)

    return out[:, :H].reshape(batch_shape + (H,))


# ---------------------------------------------------------------------------
# Kernel 2: fused QSAL layer (surrogate Q/K/V + Gaussian attention + residual)
# ---------------------------------------------------------------------------
def _qsal_fused_kernel(x_ref, xt_ref, wq_ref, wkt_ref, wv_ref, o_ref):
    # Per batch element (leading batch dim squeezed):
    #   x_ref: (S, d), xt_ref: (d, S), wq_ref: (d, 1), wkt_ref: (1, d),
    #   wv_ref: (d, d), o_ref: (S, d).
    x = x_ref[...].astype(jnp.float32)
    xt = xt_ref[...].astype(jnp.float32)

    # Surrogate Q qnode (d -> 1): weighted feature map + L2 norm (H=1).
    q = jnp.dot(x, wq_ref[...].astype(jnp.float32),
                preferred_element_type=jnp.float32)                 # (S, 1)
    q = q * jax.lax.rsqrt(q * q + _EPS)

    # Surrogate K qnode, produced directly in (1, S) lane layout (x is fed
    # pre-transposed) so the (S, S) score matrix needs no in-kernel transpose.
    kt = jnp.dot(wkt_ref[...].astype(jnp.float32), xt,
                 preferred_element_type=jnp.float32)                # (1, S)
    kt = kt * jax.lax.rsqrt(kt * kt + _EPS)

    # Surrogate V qnode (d -> d), row-wise L2 norm.
    v = jnp.dot(x, wv_ref[...].astype(jnp.float32),
                preferred_element_type=jnp.float32)                 # (S, d)
    v = v * jax.lax.rsqrt(jnp.sum(v * v, axis=-1, keepdims=True) + _EPS)

    # Gaussian (RBF) attention normalized over keys, then residual add.
    diff = q - kt                                                   # (S, S)
    alpha = jnp.exp(-(diff * diff))
    denom = jnp.sum(alpha, axis=-1, keepdims=True)                  # (S, 1)
    num = jnp.dot(alpha, v, preferred_element_type=jnp.float32)     # (S, d)
    o_ref[...] = (x + num / denom).astype(o_ref.dtype)


def qsal_forward(x, wq, wk, wv):
    """One QSAL_pennylane layer (surrogate qnodes), fused in a single kernel."""
    B, S, d = x.shape
    assert wq.shape == (d, 1) and wk.shape == (d, 1) and wv.shape == (d, d)

    xt = jnp.swapaxes(x, 1, 2)          # (B, d, S): K lands in lane layout
    wkt = wk.reshape((1, d))            # (1, d)

    return pl.pallas_call(
        _qsal_fused_kernel,
        out_shape=jax.ShapeDtypeStruct((B, S, d), x.dtype),
        grid_spec=pltpu.PrefetchScalarGridSpec(
            num_scalar_prefetch=0,
            grid=(B,),
            in_specs=[
                pl.BlockSpec((None, S, d), lambda b: (b, 0, 0)),
                pl.BlockSpec((None, d, S), lambda b: (b, 0, 0)),
                pl.BlockSpec((d, 1), lambda b: (0, 0)),
                pl.BlockSpec((1, d), lambda b: (0, 0)),
                pl.BlockSpec((d, d), lambda b: (0, 0)),
            ],
            out_specs=pl.BlockSpec((None, S, d), lambda b: (b, 0, 0)),
        ),
        compiler_params=pltpu.CompilerParams(
            dimension_semantics=("parallel",),
        ),
    )(x, xt, wq, wkt, wv)


def qsann_forward(x, layer_params):
    """QSANN_pennylane.forward: stack of fused QSAL layers."""
    out = x
    for wq, wk, wv in layer_params:
        out = qsal_forward(out, wq, wk, wv)
    return out


# ---------------------------------------------------------------------------
# Pure-JAX references
# ---------------------------------------------------------------------------
def _torch_layer_reference(inputs, weights, compute_dtype=jnp.bfloat16):
    D, H = weights.shape
    x2d = inputs.reshape((-1, D)).astype(compute_dtype)
    y = jnp.dot(x2d, weights.astype(compute_dtype),
                preferred_element_type=jnp.float32)
    inv = jax.lax.rsqrt(jnp.sum(y * y, axis=-1, keepdims=True) + _EPS)
    out = (y * inv).astype(inputs.dtype)
    return out.reshape(inputs.shape[:-1] + (H,))


def _qsal_reference(x, wq, wk, wv):
    xf = x.astype(jnp.float32)
    q = xf @ wq.astype(jnp.float32)
    q = q * jax.lax.rsqrt(q * q + _EPS)                                # (B,S,1)
    k = xf @ wk.astype(jnp.float32)
    k = k * jax.lax.rsqrt(k * k + _EPS)                                # (B,S,1)
    v = xf @ wv.astype(jnp.float32)
    v = v * jax.lax.rsqrt(jnp.sum(v * v, axis=-1, keepdims=True) + _EPS)
    alpha = jnp.exp(-(q[:, :, None, :] - k[:, None, :, :]) ** 2)      # (B,S,S,1)
    denom = jnp.sum(alpha, axis=2, keepdims=True)                      # (B,S,1,1)
    sum_w = jnp.sum((alpha / denom) * v[:, None, :, :], axis=2)        # (B,S,d)
    return (xf + sum_w).astype(x.dtype)


def _qsann_reference(x, layer_params):
    out = x
    for wq, wk, wv in layer_params:
        out = _qsal_reference(out, wq, wk, wv)
    return out


if __name__ == "__main__":
    key = jax.random.PRNGKey(0)
    k_tlx, k_tlw, k_x, k_layers = jax.random.split(key, 4)

    # Shapes implied by QSAL_pennylane: num_q n=4, Denc=2 -> d = n*(Denc+2) = 16.
    n, Denc = 4, 2
    d = n * (Denc + 2)                                                 # 16

    # --- 1) standalone TorchLayer kernel (batched rows, qnode d -> d) ----
    x_tl = jax.random.normal(k_tlx, (4, 64, d), dtype=jnp.float32)
    w_tl = 0.1 * jax.random.normal(k_tlw, (d, d), dtype=jnp.float32)
    out_tl = jax.block_until_ready(torch_layer_forward(x_tl, w_tl,
                                                       force_pallas=True))
    ref_tl = _torch_layer_reference(x_tl, w_tl)
    assert out_tl.shape == (4, 64, d), out_tl.shape
    assert out_tl.dtype == x_tl.dtype, out_tl.dtype
    err_tl = float(jnp.max(jnp.abs(out_tl.astype(jnp.float32)
                                   - ref_tl.astype(jnp.float32))))
    assert err_tl < 2e-3, err_tl

    # --- 2) full QSANN forward: stacked fused QSAL layers -----------------
    batch, S, num_layers = 2, 16, 2
    x = jax.random.normal(k_x, (batch, S, d), dtype=jnp.float32)
    layer_params = []
    lk = k_layers
    for _ in range(num_layers):
        lk, kq, kk, kv = jax.random.split(lk, 4)
        layer_params.append(
            (0.3 * jax.random.normal(kq, (d, 1), dtype=jnp.float32),
             0.3 * jax.random.normal(kk, (d, 1), dtype=jnp.float32),
             0.3 * jax.random.normal(kv, (d, d), dtype=jnp.float32)))

    out = jax.block_until_ready(qsann_forward(x, layer_params))
    ref = _qsann_reference(x, layer_params)
    assert out.shape == (batch, S, d), out.shape
    assert out.dtype == x.dtype, out.dtype
    err = float(jnp.max(jnp.abs(out - ref)))
    assert err < 1e-3, err

    print("KERNEL_OK")
</pallas_src>

<mosaic_0001>
module attributes {stable_mosaic.version = 11 : i64} {
  func.func @_qnode_l2norm_kernel(%arg0: i32, %arg1: memref<256x16xbf16, #tpu.memory_space<vmem>>, %arg2: memref<16x128xbf16, #tpu.memory_space<vmem>>, %arg3: memref<256x128xf32, #tpu.memory_space<vmem>>) attributes {dimension_semantics = [#tpu.dimension_semantics<parallel>], iteration_bounds = array<i64: 1>, scalar_prefetch = 0 : i64, scratch_operands = 0 : i64, tpu.core_type = #tpu.core_type<tc>, window_params = [{transform_indices = @transform_0, window_bounds = array<i64: 256, 16>}, {pipeline_mode = #tpu.pipeline_mode<synchronous>, transform_indices = @transform_1, window_bounds = array<i64: 16, 128>}, {transform_indices = @transform_2, window_bounds = array<i64: 256, 128>}]} {
    %c0 = arith.constant 0 : index
    %c0_0 = arith.constant 0 : index
    %0 = vector.load %arg1[%c0, %c0_0] : memref<256x16xbf16, #tpu.memory_space<vmem>>, vector<256x16xbf16>
    %c0_1 = arith.constant 0 : index
    %c0_2 = arith.constant 0 : index
    %1 = vector.load %arg2[%c0_1, %c0_2] : memref<16x128xbf16, #tpu.memory_space<vmem>>, vector<16x128xbf16>
    %cst = arith.constant dense<0.000000e+00> : vector<256x128xf32>
    %2 = tpu.matmul %0, %1, %cst {dimension_numbers = #tpu.dot_dimension_numbers<[1], [0], [0], [1], [0, 0, 1, 1], [], []>} : vector<256x16xbf16>, vector<16x128xbf16>, vector<256x128xf32> -> vector<256x128xf32>
    %3 = arith.mulf %2, %2 : vector<256x128xf32>
    %cst_3 = arith.constant dense<0.000000e+00> : vector<256xf32>
    %4 = vector.multi_reduction <add>, %3, %cst_3 [1] : vector<256x128xf32> to vector<256xf32>
    %5 = vector.shape_cast %4 : vector<256xf32> to vector<256x1xf32>
    %cst_4 = arith.constant 9.99999996E-13 : f32
    %6 = vector.broadcast %cst_4 : f32 to vector<256x1xf32>
    %7 = arith.addf %5, %6 : vector<256x1xf32>
    %8 = math.rsqrt %7 : vector<256x1xf32>
    %9 = vector.broadcast %8 : vector<256x1xf32> to vector<256x128xf32>
    %10 = arith.mulf %2, %9 : vector<256x128xf32>
    %c0_5 = arith.constant 0 : index
    %c0_6 = arith.constant 0 : index
    %11 = vector.load %arg3[%c0_5, %c0_6] : memref<256x128xf32, #tpu.memory_space<vmem>>, vector<256x128xf32>
    tpu.vector_store %arg3[%c0_5, %c0_6], %10 {strides = array<i32>} : memref<256x128xf32, #tpu.memory_space<vmem>>, vector<256x128xf32>,
    return
  }
  func.func @transform_0(%arg0: i32) -> (i32, i32) {
    %c0_i32 = arith.constant 0 : i32
    %c0_i32_0 = arith.constant 0 : i32
    return %arg0, %c0_i32 : i32, i32
  }
  func.func @transform_1(%arg0: i32) -> (i32, i32) {
    %c0_i32 = arith.constant 0 : i32
    %c0_i32_0 = arith.constant 0 : i32
    %c0_i32_1 = arith.constant 0 : i32
    return %c0_i32, %c0_i32_0 : i32, i32
  }
  func.func @transform_2(%arg0: i32) -> (i32, i32) {
    %c0_i32 = arith.constant 0 : i32
    %c0_i32_0 = arith.constant 0 : i32
    return %arg0, %c0_i32 : i32, i32
  }
}

module attributes {stable_mosaic.version = 11 : i64} {
  func.func @_qnode_l2norm_kernel(%arg0: i32, %arg1: memref<256x16xbf16, #tpu.memory_space<vmem>>, %arg2: memref<16x128xbf16, #tpu.memory_space<vmem>>, %arg3: memref<256x128xf32, #tpu.memory_space<vmem>>) attributes {dimension_semantics = [#tpu.dimension_semantics<parallel>], iteration_bounds = array<i64: 1>, scalar_prefetch = 0 : i64, scratch_operands = 0 : i64, tpu.core_type = #tpu.core_type<tc>, window_params = [{transform_indices = @transform_0, window_bounds = array<i64: 256, 16>}, {pipeline_mode = #tpu.pipeline_mode<synchronous>, transform_indices = @transform_1, window_bounds = array<i64: 16, 128>}, {transform_indices = @transform_2, window_bounds = array<i64: 256, 128>}]} {
    %c0 = arith.constant 0 : index
    %c0_0 = arith.constant 0 : index
    %0 = vector.load %arg1[%c0, %c0_0] : memref<256x16xbf16, #tpu.memory_space<vmem>>, vector<256x16xbf16>
    %c0_1 = arith.constant 0 : index
    %c0_2 = arith.constant 0 : index
    %1 = vector.load %arg2[%c0_1, %c0_2] : memref<16x128xbf16, #tpu.memory_space<vmem>>, vector<16x128xbf16>
    %cst = arith.constant dense<0.000000e+00> : vector<256x128xf32>
    %2 = tpu.matmul %0, %1, %cst {dimension_numbers = #tpu.dot_dimension_numbers<[1], [0], [0], [1], [0, 0, 1, 1], [], []>} : vector<256x16xbf16>, vector<16x128xbf16>, vector<256x128xf32> -> vector<256x128xf32>
    %3 = arith.mulf %2, %2 : vector<256x128xf32>
    %cst_3 = arith.constant dense<0.000000e+00> : vector<256xf32>
    %4 = vector.multi_reduction <add>, %3, %cst_3 [1] : vector<256x128xf32> to vector<256xf32>
    %5 = vector.shape_cast %4 : vector<256xf32> to vector<256x1xf32>
    %cst_4 = arith.constant 9.99999996E-13 : f32
    %6 = vector.broadcast %cst_4 : f32 to vector<256x1xf32>
    %7 = arith.addf %5, %6 : vector<256x1xf32>
    %8 = math.rsqrt %7 : vector<256x1xf32>
    %9 = vector.broadcast %8 : vector<256x1xf32> to vector<256x128xf32>
    %10 = arith.mulf %2, %9 : vector<256x128xf32>
    %c0_5 = arith.constant 0 : index
    %c0_6 = arith.constant 0 : index
    %11 = vector.load %arg3[%c0_5, %c0_6] : memref<256x128xf32, #tpu.memory_space<vmem>>, vector<256x128xf32>
    tpu.vector_store %arg3[%c0_5, %c0_6], %10 {strides = array<i32>} : memref<256x128xf32, #tpu.memory_space<vmem>>, vector<256x128xf32>,
    return
  }
  func.func @transform_0(%arg0: i32) -> (i32, i32) {
    %c0_i32 = arith.constant 0 : i32
    %c0_i32_0 = arith.constant 0 : i32
    return %arg0, %c0_i32 : i32, i32
  }
  func.func @transform_1(%arg0: i32) -> (i32, i32) {
    %c0_i32 = arith.constant 0 : i32
    %c0_i32_0 = arith.constant 0 : i32
    %c0_i32_1 = arith.constant 0 : i32
    return %c0_i32, %c0_i32_0 : i32, i32
  }
  func.func @transform_2(%arg0: i32) -> (i32, i32) {
    %c0_i32 = arith.constant 0 : i32
    %c0_i32_0 = arith.constant 0 : i32
    return %arg0, %c0_i32 : i32, i32
  }
}

</mosaic_0001>

<bundles_post_ra>
// kernel: tpu_custom_call.1
= control target key start
LH: loop header
LB: loop body
LE: loop exit
PB: predicated region body
PF: predicated region fallthrough
CT: control target
= control target key end

     0   :  { %vm133_vm0 = vcmask 130048   ;;  %s1593_s0 = inlined_call_operand.vmem [shape: bf16[256,16], index: 0, kind: input, shape index: {}]   ;;  %s1594_s1 = inlined_call_operand.vmem [shape: bf16[16,128], index: 1, kind: input, shape index: {}]   ;;  %s1595_s2 = inlined_call_operand.hbm [shape: f32[256,128], index: 2, kind: output, shape index: {}]  }
   0x1   :  { %v901_v0 = vld [vmem:[%s1594_s1] sm:$0xff] }
   0x2   :  { %v885_v1 = vld [vmem:[%s1593_s0] sm:$0xff]  ;;  %189 = vmatpush.bf16.msra.mxu0 %v901_v0  ;;  %902 = vmatpush.bf16.msra.mxu1 %v901_v0 }
   0x3   :  { %v889_v2 = vld [vmem:[%s1593_s0 + $0x20] sm:$0xff]  ;;  %903 = vmatpush.bf16.msra.mxu2 %v901_v0  ;;  %904 = vmatpush.bf16.msra.mxu3 %v901_v0 }
   0x4   :  { %v893_v3 = vld [vmem:[%s1593_s0 + $0x40] sm:$0xff] }
   0x5   :  { %v897_v4 = vld [vmem:[%s1593_s0 + $0x60] sm:$0xff] }
   0x6   :  { %7 = vsyncpa [#allocation3], 0  ;;  %869 = vmatmul.msk.bf16.vlgmr.msra.gmra.mxu0 %vm133_vm0, %v885_v1  ;;  %873 = vmatmul.msk.bf16.vlgmr.msra.gmra.mxu1 %vm133_vm0, %v889_v2  ;;  %v886_v5 = vld [vmem:[%s1593_s0 + $0x8] sm:$0xff]  ;;  %v887_v9 = vld [vmem:[%s1593_s0 + $0x10] sm:$0xff]  ;;  %s789_s17 = sshll.u32 %s1595_s2, 4  ;;  %s999_s18 = smov 128   ;;  %s790_s17 = int_to_ptr.hbm [resolvable:$true] %s789_s17 }
   0x7   :  { %877 = vmatmul.msk.bf16.vlgmr.msra.gmra.mxu2 %vm133_vm0, %v893_v3  ;;  %881 = vmatmul.msk.bf16.vlgmr.msra.gmra.mxu3 %vm133_vm0, %v897_v4  ;;  %v890_v6 = vld [vmem:[%s1593_s0 + $0x28] sm:$0xff]  ;;  %v891_v10 = vld [vmem:[%s1593_s0 + $0x30] sm:$0xff]  ;;  %v888_v13 = vld [vmem:[%s1593_s0 + $0x18] sm:$0xff]  ;;  %s1000_s1 = smov 8  }
   0x8   :  { %v898_v7 = vld [vmem:[%s1593_s0 + $0x68] sm:$0xff]  ;;  %v895_v11 = vld [vmem:[%s1593_s0 + $0x50] sm:$0xff]  ;;  %v892_v14 = vld [vmem:[%s1593_s0 + $0x38] sm:$0xff] }
   0x9   :  { %v894_v8 = vld [vmem:[%s1593_s0 + $0x48] sm:$0xff]  ;;  %v899_v12 = vld [vmem:[%s1593_s0 + $0x70] sm:$0xff]  ;;  %v896_v15 = vld [vmem:[%s1593_s0 + $0x58] sm:$0xff] }
   0xa   :  { %v900_v16 = vld [vmem:[%s1593_s0 + $0x78] sm:$0xff]  ;;  %s998_s0 = smov [#allocation2]  }
   0xb   :  { %s787_s14 = sshll.u32 %s998_s0, 4  ;;  %s788_s14 = int_to_ptr.vmem [resolvable:$true] %s787_s14 }
  0x16   :  { %870 = vmatmul.msk.bf16.gmra.mxu0 %vm133_vm0, %v886_v5  ;;  %874 = vmatmul.msk.bf16.gmra.mxu1 %vm133_vm0, %v890_v6 }
  0x17   :  { %882 = vmatmul.msk.bf16.gmra.mxu3 %vm133_vm0, %v898_v7  ;;  %878 = vmatmul.msk.bf16.gmra.mxu2 %vm133_vm0, %v894_v8 }
  0x26   :  { %871 = vmatmul.msk.bf16.gmra.mxu0 %vm133_vm0, %v887_v9  ;;  %875 = vmatmul.msk.bf16.gmra.mxu1 %vm133_vm0, %v891_v10 }
  0x27   :  { %879 = vmatmul.msk.bf16.gmra.mxu2 %vm133_vm0, %v895_v11  ;;  %883 = vmatmul.msk.bf16.gmra.mxu3 %vm133_vm0, %v899_v12 }
  0x36   :  { %872 = vmatmul.msk.bf16.gmra.mxu0 %vm133_vm0, %v888_v13  ;;  %876 = vmatmul.msk.bf16.gmra.mxu1 %vm133_vm0, %v892_v14 }
  0x37   :  { %880 = vmatmul.msk.bf16.gmra.mxu2 %vm133_vm0, %v896_v15  ;;  %884 = vmatmul.msk.bf16.gmra.mxu3 %vm133_vm0, %v900_v16 }
  0x83   :  { %v1083_v17 = vpop.f32.mrf.mxu0  ;;  %v1085_v18 = vpop.f32.mrf.mxu1 }
  0x84   :  { %v279_v19 = vmul.f32 %v1085_v18, %v1085_v18  ;;  %v271_v20 = vmul.f32 %v1083_v17, %v1083_v17 }
  0x86   :  { %319 = vadd.xlane.f32.xlu2 %v279_v19  ;;  %303 = vadd.xlane.f32.xlu0 %v271_v20 }
  0x8a   :  { %v1091_v21 = vpop.f32.mrf.mxu2  ;;  %v1093_v22 = vpop.f32.mrf.mxu3 }
  0x8b   :  { %v1095_v23 = vpop.f32.mrf.mxu0  ;;  %v287_v24 = vmul.f32 %v1091_v21, %v1091_v21  ;;  %v1099_v25 = vpop.f32.mrf.mxu1  ;;  %v295_v26 = vmul.f32 %v1093_v22, %v1093_v22 }
  0x8c   :  { %v272_v32 = vmul.f32 %v1095_v23, %v1095_v23  ;;  %v280_v38 = vmul.f32 %v1099_v25, %v1099_v25 }
  0x8d   :  { %335 = vadd.xlane.f32.xlu1 %v287_v24 }
  0x8e   :  { %351 = vadd.xlane.f32.xlu0 %v295_v26 }
  0x92   :  { %v1103_v27 = vpop.f32.mrf.mxu2  ;;  %v1105_v28 = vpop.f32.mrf.mxu3 }
  0x93   :  { %v296_v29 = vmul.f32 %v1105_v28, %v1105_v28  ;;  %v288_v30 = vmul.f32 %v1103_v27, %v1103_v27  ;;  %v1111_v31 = vpop.f32.mrf.mxu0  ;;  %v1115_v33 = vpop.f32.mrf.mxu1 }
  0x94   :  { %v273_v34 = vmul.f32 %v1111_v31, %v1111_v31  ;;  %v281_v42 = vmul.f32 %v1115_v33, %v1115_v33 }
  0x95   :  { %353 = vadd.xlane.f32.xlu1 %v296_v29  ;;  %337 = vadd.xlane.f32.xlu2 %v288_v30 }
  0x96   :  { %305 = vadd.xlane.f32.xlu0 %v272_v32 }
  0x9a   :  { %v1119_v35 = vpop.f32.mrf.mxu3  ;;  %v1121_v36 = vpop.f32.mrf.mxu2 }
  0x9b   :  { %v297_v37 = vmul.f32 %v1119_v35, %v1119_v35  ;;  %v1127_v39 = vpop.f32.mrf.mxu0  ;;  %v1129_v40 = vpop.f32.mrf.mxu1  ;;  %v289_v43 = vmul.f32 %v1121_v36, %v1121_v36 }
  0x9c   :  { %v282_v41 = vmul.f32 %v1129_v40, %v1129_v40  ;;  %v274_v50 = vmul.f32 %v1127_v39, %v1127_v39 }
  0x9d   :  { %355 = vadd.xlane.f32.xlu2 %v297_v37  ;;  %307 = vadd.xlane.f32.xlu1 %v273_v34 }
  0x9e   :  { %321 = vadd.xlane.f32.xlu0 %v280_v38 }
  0xa2   :  { %v1137_v44 = vpop.f32.mrf.mxu2  ;;  %v1141_v46 = vpop.f32.mrf.mxu3 }
  0xa3   :  { %v1139_v45 = vpop.f32.mrf.mxu0  ;;  %v1145_v48 = vpop.f32.mrf.mxu1  ;;  %v298_v51 = vmul.f32 %v1141_v46, %v1141_v46  ;;  %v290_v55 = vmul.f32 %v1137_v44, %v1137_v44 }
  0xa4   :  { %v275_v47 = vmul.f32 %v1139_v45, %v1139_v45  ;;  %v283_v53 = vmul.f32 %v1145_v48, %v1145_v48 }
  0xa5   :  { %325 = vadd.xlane.f32.xlu2 %v282_v41  ;;  %323 = vadd.xlane.f32.xlu1 %v281_v42 }
  0xa6   :  { %339 = vadd.xlane.f32.xlu0 %v289_v43 }
  0xaa   :  { %v1147_v49 = vpop.f32.mrf.mxu2  ;;  %v1165_v58 = vpop.f32.mrf.mxu3 }
  0xab   :  { %v291_v52 = vmul.f32 %v1147_v49, %v1147_v49  ;;  %v1161_v56 = vpop.f32.mrf.mxu1  ;;  %v1163_v57 = vpop.f32.mrf.mxu0  ;;  %v299_v59 = vmul.f32 %v1165_v58, %v1165_v58 }
  0xac   :  { %v276_v60 = vmul.f32 %v1163_v57, %v1163_v57  ;;  %v284_v3 = vmul.f32 %v1161_v56, %v1161_v56 }
  0xad   :  { %309 = vadd.xlane.f32.xlu1 %v274_v50  ;;  %311 = vadd.xlane.f32.xlu2 %v275_v47 }
  0xae   :  { %357 = vadd.xlane.f32.xlu0 %v298_v51 }
  0xb2   :  { %v1157_v54 = vpop.f32.mrf.mxu2  ;;  %v1185_v4 = vpop.f32.mrf.mxu3 }
  0xb3   :  { %v292_v61 = vmul.f32 %v1157_v54, %v1157_v54  ;;  %v1175_v63 = vpop.f32.mrf.mxu1  ;;  %v1177_v0 = vpop.f32.mrf.mxu0  ;;  %v300_v13 = vmul.f32 %v1185_v4, %v1185_v4 }
  0xb4   :  { %v285_v1 = vmul.f32 %v1175_v63, %v1175_v63  ;;  %v277_v2 = vmul.f32 %v1177_v0, %v1177_v0 }
  0xb5   :  { %341 = vadd.xlane.f32.xlu1 %v290_v55  ;;  %343 = vadd.xlane.f32.xlu2 %v291_v52 }
  0xb6   :  { %327 = vadd.xlane.f32.xlu0 %v283_v53 }
  0xba   :  { %v1173_v62 = vpop.f32.mrf.mxu2  ;;  %v1197_v10 = vpop.f32.mrf.mxu3 }
  0xbb   :  { %v1189_v6 = vpop.f32.mrf.mxu1  ;;  %v293_v8 = vmul.f32 %v1173_v62, %v1173_v62  ;;  %v1199_v11 = vpop.f32.mrf.mxu0  ;;  %v301_v14 = vmul.f32 %v1197_v10, %v1197_v10 }
  0xbc   :  { %v286_v9 = vmul.f32 %v1189_v6, %v1189_v6  ;;  %v278_v12 = vmul.f32 %v1199_v11, %v1199_v11 }
  0xbd   :  { %359 = vadd.xlane.f32.xlu1 %v299_v59  ;;  %313 = vadd.xlane.f32.xlu2 %v276_v60 }
  0xbe   :  { %345 = vadd.xlane.f32.xlu0 %v292_v61 }
  0xc2   :  { %v1187_v5 = vpop.f32.mrf.mxu2  ;;  %v1207_v15 = vpop.f32.mrf.mxu3 }
  0xc3   :  { %v294_v7 = vmul.f32 %v1187_v5, %v1187_v5  ;;  %v302_v16 = vmul.f32 %v1207_v15, %v1207_v15 }
  0xc5   :  { %329 = vadd.xlane.f32.xlu1 %v284_v3  ;;  %331 = vadd.xlane.f32.xlu2 %v285_v1 }
  0xc6   :  { %315 = vadd.xlane.f32.xlu0 %v277_v2 }
  0xcd   :  { %347 = vadd.xlane.f32.xlu1 %v293_v8  ;;  %349 = vadd.xlane.f32.xlu2 %v294_v7 }
  0xce   :  { %333 = vadd.xlane.f32.xlu0 %v286_v9 }
  0xd5   :  { %361 = vadd.xlane.f32.xlu2 %v300_v13  ;;  %317 = vadd.xlane.f32.xlu1 %v278_v12 }
  0xd6   :  { %363 = vadd.xlane.f32.xlu0 %v301_v14 }
  0xdd   :  { %365 = vadd.xlane.f32.xlu1 %v302_v16 }
  0xf9   :  { %v320_v19 = vpop.xlane.xlu2 %319  ;;  %v304_v20 = vpop.xlane.xlu0 %303 }
  0xfa   :  { %v375_v24 = vadd.f32 1e-12, %v320_v19  ;;  %v367_v26 = vadd.f32 1e-12, %v304_v20 }
  0xfc   :  { %908 = vrsqrt.f32 %v375_v24  ;;  %vm485_vm1 = vweird.f32 %v375_v24  ;;  %vm405_vm3 = vweird.f32 %v367_v26 }
  0xfd   :  { %910 = vrsqrt.f32 %v367_v26 }
 0x100   :  { %v336_v29 = vpop.xlane.xlu1 %335 }
 0x101   :  { %v383_v30 = vadd.f32 1e-12, %v336_v29  ;;  %v352_v32 = vpop.xlane.xlu0 %351 }
 0x102   :  { %v909_v34 = vpop.eup %908  ;;  %v1211_v37 = vadd.f32 1e-12, %v352_v32 }
 0x103   :  { %v911_v38 = vpop.eup %910  ;;  %v480_v41 = vmul.f32 %v909_v34, %v375_v24  ;;  %912 = vrsqrt.f32 %v383_v30  ;;  %vm486_vm2 = vweird.f32 %v909_v34  ;;  %vm565_vm8 = vweird.f32 %v383_v30 }
 0x104   :  { %v400_v42 = vmul.f32 %v911_v38, %v367_v26  ;;  %914 = vrsqrt.f32 %v1211_v37  ;;  %vm487_vm4 = vmor %vm485_vm1, %vm486_vm2  ;;  %vm406_vm5 = vweird.f32 %v911_v38  ;;  %vm645_vm10 = vweird.f32 %v1211_v37 }
 0x105   :  { %v481_v43 = vmul.f32 %v909_v34, %v480_v41  ;;  %vm407_vm6 = vmor %vm405_vm3, %vm406_vm5 }
 0x106   :  { %v401_v47 = vmul.f32 %v911_v38, %v400_v42 }
 0x107   :  { %v482_v50 = vmul.f32 0.5, %v481_v43 }
 0x108   :  { %v402_v51 = vmul.f32 0.5, %v401_v47  ;;  %v354_v52 = vpop.xlane.xlu1 %353  ;;  %v338_v53 = vpop.xlane.xlu2 %337 }
 0x109   :  { %v913_v55 = vpop.eup %912  ;;  %v483_v59 = vsub.f32 1.5, %v482_v50  ;;  %v1214_v60 = vadd.f32 1e-12, %v354_v52  ;;  %v1216_v61 = vadd.f32 1e-12, %v338_v53  ;;  %v306_v1 = vpop.xlane.xlu0 %305 }
 0x10a   :  { %v915_v2 = vpop.eup %914  ;;  %v403_v3 = vsub.f32 1.5, %v402_v51  ;;  %v560_v7 = vmul.f32 %v913_v55, %v383_v30  ;;  %v1218_v8 = vadd.f32 1e-12, %v306_v1  ;;  %vm566_vm7 = vweird.f32 %v913_v55 }
 0x10b   :  { %v484_v9 = vmul.f32 %v909_v34, %v483_v59  ;;  %v640_v12 = vmul.f32 %v915_v2, %v1211_v37  ;;  %916 = vrsqrt.f32 %v1214_v60  ;;  %vm646_vm9 = vweird.f32 %v915_v2  ;;  %vm567_vm11 = vmor %vm565_vm8, %vm566_vm7 }
 0x10c   :  { %v404_v13 = vmul.f32 %v911_v38, %v403_v3  ;;  %v561_v14 = vmul.f32 %v913_v55, %v560_v7  ;;  %918 = vrsqrt.f32 %v1216_v61  ;;  %vm647_vm12 = vmor %vm645_vm10, %vm646_vm9  ;;  %vm655_vm13 = vweird.f32 %v1214_v60 }
 0x10d   :  { %v488_v16 = vsel %vm487_vm4, %v909_v34, %v484_v9  ;;  %v641_v19 = vmul.f32 %v915_v2, %v640_v12  ;;  %920 = vrsqrt.f32 %v1218_v8  ;;  %vm575_vm2 = vweird.f32 %v1216_v61 }
 0x10e   :  { %v727_v20 = vmul.f32 %v488_v16, %v1085_v18  ;;  %v408_v24 = vsel %vm407_vm6, %v911_v38, %v404_v13  ;;  %v562_v29 = vmul.f32 0.5, %v561_v14  ;;  %vm415_vm3 = vweird.f32 %v1218_v8 }
 0x10f   :  { %v719_v32 = vmul.f32 %v408_v24, %v1083_v17  ;;  %v642_v41 = vmul.f32 0.5, %v641_v19 }
 0x110   :  { %759 = vst [vmem:[#allocation2 + $0x40] sm:$0xff] %v727_v20  ;;  %v563_v42 = vsub.f32 1.5, %v562_v29  ;;  %v356_v43 = vpop.xlane.xlu2 %355  ;;  %v308_v47 = vpop.xlane.xlu1 %307 }
 0x111   :  { %v917_v50 = vpop.eup %916  ;;  %751 = vst [vmem:[#allocation2] sm:$0xff] %v719_v32  ;;  %v643_v26 = vsub.f32 1.5, %v642_v41  ;;  %v1227_v34 = vadd.f32 1e-12, %v356_v43  ;;  %v322_v51 = vpop.xlane.xlu0 %321  ;;  %v1231_v38 = vadd.f32 1e-12, %v308_v47 }
 0x112   :  { %v919_v52 = vpop.eup %918  ;;  %v564_v18 = vmul.f32 %v913_v55, %v563_v42  ;;  %v650_v17 = vmul.f32 %v917_v50, %v1214_v60  ;;  %v1236_v30 = vadd.f32 1e-12, %v322_v51  ;;  %vm656_vm14 = vweird.f32 %v917_v50 }
 0x113   :  { %v921_v53 = vpop.eup %920  ;;  %v644_v59 = vmul.f32 %v915_v2, %v643_v26  ;;  %v570_v1 = vmul.f32 %v919_v52, %v1216_v61  ;;  %922 = vrsqrt.f32 %v1227_v34  ;;  %vm576_vm15 = vweird.f32 %v919_v52  ;;  %vm657_vm1 = vmor %vm655_vm13, %vm656_vm14 }
 0x114   :  { %v568_v3 = vsel %vm567_vm11, %v913_v55, %v564_v18  ;;  %v651_v7 = vmul.f32 %v917_v50, %v650_v17  ;;  %v410_v37 = vmul.f32 %v921_v53, %v1218_v8  ;;  %924 = vrsqrt.f32 %v1231_v38  ;;  %vm577_vm4 = vmor %vm575_vm2, %vm576_vm15 }
 0x115   :  { %v735_v9 = vmul.f32 %v568_v3, %v1091_v21  ;;  %v648_v12 = vsel %vm647_vm12, %v915_v2, %v644_v59  ;;  %v571_v13 = vmul.f32 %v919_v52, %v570_v1  ;;  %926 = vrsqrt.f32 %v1236_v30 }
 0x116   :  { %v743_v14 = vmul.f32 %v648_v12, %v1093_v22  ;;  %v652_v16 = vmul.f32 0.5, %v651_v7  ;;  %v411_v19 = vmul.f32 %v921_v53, %v410_v37  ;;  %vm416_vm0 = vweird.f32 %v921_v53 }
 0x117   :  { %767 = vst [vmem:[#allocation2 + $0x80] sm:$0xff] %v735_v9  ;;  %v572_v20 = vmul.f32 0.5, %v571_v13  ;;  %vm417_vm5 = vmor %vm415_vm3, %vm416_vm0  ;;  %vm665_vm6 = vweird.f32 %v1227_v34  ;;  %vm425_vm8 = vweird.f32 %v1231_v38  ;;  %vm495_vm9 = vweird.f32 %v1236_v30 }
 0x118   :  { %775 = vst [vmem:[#allocation2 + $0xc0] sm:$0xff] %v743_v14  ;;  %v653_v55 = vsub.f32 1.5, %v652_v16  ;;  %v412_v24 = vmul.f32 0.5, %v411_v19  ;;  %v326_v29 = vpop.xlane.xlu2 %325  ;;  %v324_v21 = vpop.xlane.xlu1 %323 }
 0x119   :  { %v1245_v2 = vpop.eup %922  ;;  %v573_v32 = vsub.f32 1.5, %v572_v20  ;;  %v1247_v22 = vadd.f32 1e-12, %v326_v29  ;;  %v1249_v41 = vadd.f32 1e-12, %v324_v21  ;;  %v340_v42 = vpop.xlane.xlu0 %339 }
 0x11a   :  { %v654_v43 = vmul.f32 %v917_v50, %v653_v55  ;;  %v413_v47 = vsub.f32 1.5, %v412_v24  ;;  %v660_v26 = vmul.f32 %v1245_v2, %v1227_v34  ;;  %v1258_v18 = vpop.eup %924  ;;  %v1274_v14 = vadd.f32 1e-12, %v340_v42 }
 0x11b   :  { %v574_v51 = vmul.f32 %v919_v52, %v573_v32  ;;  %928 = vrsqrt.f32 %v1247_v22  ;;  %v1263_v3 = vpop.eup %926  ;;  %v420_v61 = vmul.f32 %v1258_v18, %v1231_v38  ;;  %vm666_vm7 = vweird.f32 %v1245_v2 }
 0x11c   :  { %v658_v17 = vsel %vm657_vm1, %v917_v50, %v654_v43  ;;  %v414_v59 = vmul.f32 %v921_v53, %v413_v47  ;;  %v661_v1 = vmul.f32 %v1245_v2, %v660_v26  ;;  %930 = vrsqrt.f32 %v1249_v41  ;;  %vm667_vm10 = vmor %vm665_vm6, %vm666_vm7 }
 0x11d   :  { %v744_v60 = vmul.f32 %v658_v17, %v1105_v28  ;;  %v578_v7 = vsel %vm577_vm4, %v919_v52, %v574_v51  ;;  %v490_v9 = vmul.f32 %v1263_v3, %v1236_v30  ;;  %v421_v13 = vmul.f32 %v1258_v18, %v420_v61 }
 0x11e   :  { %v736_v8 = vmul.f32 %v578_v7, %v1103_v27  ;;  %v418_v50 = vsel %vm417_vm5, %v921_v53, %v414_v59  ;;  %v662_v37 = vmul.f32 0.5, %v661_v1  ;;  %932 = vrsqrt.f32 %v1274_v14 }
 0x11f   :  { %776 = vst [vmem:[#allocation2 + $0xc8] sm:$0xff] %v744_v60  ;;  %v720_v12 = vmul.f32 %v418_v50, %v1095_v23  ;;  %v491_v27 = vmul.f32 %v1263_v3, %v490_v9  ;;  %v422_v19 = vmul.f32 0.5, %v421_v13  ;;  %vm426_vm11 = vweird.f32 %v1258_v18 }
 0x120   :  { %768 = vst [vmem:[#allocation2 + $0x88] sm:$0xff] %v736_v8  ;;  %v663_v28 = vsub.f32 1.5, %v662_v37  ;;  %v310_v52 = vpop.xlane.xlu1 %309  ;;  %v312_v53 = vpop.xlane.xlu2 %311  ;;  %vm496_vm12 = vweird.f32 %v1263_v3  ;;  %vm427_vm13 = vmor %vm425_vm8, %vm426_vm11  ;;  %vm515_vm14 = vweird.f32 %v1247_v22  ;;  %vm505_vm2 = vweird.f32 %v1249_v41 }
 0x121   :  { %v1279_v16 = vpop.eup %928  ;;  %752 = vst [vmem:[#allocation2 + $0x8] sm:$0xff] %v720_v12  ;;  %v1283_v23 = vadd.f32 1e-12, %v310_v52  ;;  %v358_v20 = vpop.xlane.xlu0 %357  ;;  %v492_v29 = vmul.f32 0.5, %v491_v27  ;;  %v423_v32 = vsub.f32 1.5, %v422_v19  ;;  %vm497_vm15 = vmor %vm495_vm9, %vm496_vm12  ;;  %vm585_vm4 = vweird.f32 %v1274_v14 }
 0x122   :  { %v1285_v55 = vpop.eup %930  ;;  %v664_v24 = vmul.f32 %v1245_v2, %v663_v28  ;;  %v510_v21 = vmul.f32 %v1279_v16, %v1247_v22  ;;  %v1305_v59 = vadd.f32 1e-12, %v312_v53  ;;  %vm516_vm0 = vweird.f32 %v1279_v16 }
 0x123   :  { %v500_v42 = vmul.f32 %v1285_v55, %v1249_v41  ;;  %934 = vrsqrt.f32 %v1283_v23  ;;  %v493_v47 = vsub.f32 1.5, %v492_v29  ;;  %v424_v34 = vmul.f32 %v1258_v18, %v423_v32  ;;  %vm517_vm3 = vmor %vm515_vm14, %vm516_vm0 }
 0x124   :  { %v668_v43 = vsel %vm667_vm10, %v1245_v2, %v664_v24  ;;  %v511_v26 = vmul.f32 %v1279_v16, %v510_v21  ;;  %v1311_v2 = vadd.f32 1e-12, %v358_v20  ;;  %v1313_v7 = vpop.eup %932  ;;  %936 = vrsqrt.f32 %v1305_v59 }
 0x125   :  { %v745_v51 = vmul.f32 %v668_v43, %v1119_v35  ;;  %v501_v17 = vmul.f32 %v1285_v55, %v500_v42  ;;  %v494_v1 = vmul.f32 %v1263_v3, %v493_v47  ;;  %v428_v35 = vsel %vm427_vm13, %v1258_v18, %v424_v34 }
 0x126   :  { %v512_v60 = vmul.f32 0.5, %v511_v26  ;;  %v721_v38 = vmul.f32 %v428_v35, %v1111_v31  ;;  %v580_v37 = vmul.f32 %v1313_v7, %v1274_v14  ;;  %vm506_vm1 = vweird.f32 %v1285_v55 }
 0x127   :  { %777 = vst [vmem:[#allocation2 + $0xd0] sm:$0xff] %v745_v51  ;;  %v502_v61 = vmul.f32 0.5, %v501_v17  ;;  %v498_v8 = vsel %vm497_vm15, %v1263_v3, %v494_v1  ;;  %938 = vrsqrt.f32 %v1311_v2  ;;  %vm507_vm5 = vmor %vm505_vm2, %vm506_vm1  ;;  %vm586_vm6 = vweird.f32 %v1313_v7 }
 0x128   :  { %v513_v50 = vsub.f32 1.5, %v512_v60  ;;  %v342_v9 = vpop.xlane.xlu1 %341  ;;  %v344_v12 = vpop.xlane.xlu2 %343  ;;  %v728_v30 = vmul.f32 %v498_v8, %v1099_v25  ;;  %753 = vst [vmem:[#allocation2 + $0x10] sm:$0xff] %v721_v38  ;;  %v581_v3 = vmul.f32 %v1313_v7, %v580_v37  ;;  %vm435_vm7 = vweird.f32 %v1283_v23  ;;  %vm587_vm9 = vmor %vm585_vm4, %vm586_vm6 }
 0x129   :  { %v1324_v13 = vpop.eup %934  ;;  %v503_v18 = vsub.f32 1.5, %v502_v61  ;;  %v328_v28 = vpop.xlane.xlu0 %327  ;;  %v1340_v52 = vadd.f32 1e-12, %v342_v9  ;;  %v1342_v53 = vadd.f32 1e-12, %v344_v12  ;;  %vm445_vm10 = vweird.f32 %v1305_v59 }
 0x12a   :  { %v514_v31 = vmul.f32 %v1279_v16, %v513_v50  ;;  %v430_v27 = vmul.f32 %v1324_v13, %v1283_v23  ;;  %760 = vst [vmem:[#allocation2 + $0x48] sm:$0xff] %v728_v30  ;;  %v582_v19 = vmul.f32 0.5, %v581_v3  ;;  %v1349_v22 = vpop.eup %936  ;;  %v1354_v21 = vadd.f32 1e-12, %v328_v28 }
 0x12b   :  { %v504_v25 = vmul.f32 %v1285_v55, %v503_v18  ;;  %940 = vrsqrt.f32 %v1340_v52  ;;  %v440_v43 = vmul.f32 %v1349_v22, %v1305_v59  ;;  %vm436_vm8 = vweird.f32 %v1324_v13 }
 0x12c   :  { %v518_v41 = vsel %vm517_vm3, %v1279_v16, %v514_v31  ;;  %v431_v20 = vmul.f32 %v1324_v13, %v430_v27  ;;  %v583_v32 = vsub.f32 1.5, %v582_v19  ;;  %942 = vrsqrt.f32 %v1342_v53  ;;  %vm437_vm11 = vmor %vm435_vm7, %vm436_vm8 }
 0x12d   :  { %v730_v24 = vmul.f32 %v518_v41, %v1129_v40  ;;  %v508_v29 = vsel %vm507_vm5, %v1285_v55, %v504_v25  ;;  %v1359_v47 = vpop.eup %938  ;;  %944 = vrsqrt.f32 %v1354_v21  ;;  %vm446_vm12 = vweird.f32 %v1349_v22 }
 0x12e   :  { %v729_v16 = vmul.f32 %v508_v29, %v1115_v33  ;;  %v432_v42 = vmul.f32 0.5, %v431_v20  ;;  %v584_v40 = vmul.f32 %v1313_v7, %v583_v32  ;;  %v441_v33 = vmul.f32 %v1349_v22, %v440_v43  ;;  %vm447_vm15 = vmor %vm445_vm10, %vm446_vm12 }
 0x12f   :  { %762 = vst [vmem:[#allocation2 + $0x58] sm:$0xff] %v730_v24  ;;  %v670_v26 = vmul.f32 %v1359_v47, %v1311_v2  ;;  %vm675_vm13 = vweird.f32 %v1311_v2  ;;  %vm676_vm14 = vweird.f32 %v1359_v47  ;;  %vm595_vm0 = vweird.f32 %v1340_v52 }
 0x130   :  { %761 = vst [vmem:[#allocation2 + $0x50] sm:$0xff] %v729_v16  ;;  %v433_v55 = vsub.f32 1.5, %v432_v42  ;;  %v360_v51 = vpop.xlane.xlu1 %359  ;;  %v314_v34 = vpop.xlane.xlu2 %313  ;;  %v588_v35 = vsel %vm587_vm9, %v1313_v7, %v584_v40  ;;  %v442_v38 = vmul.f32 0.5, %v441_v33  ;;  %vm605_vm1 = vweird.f32 %v1342_v53  ;;  %vm677_vm3 = vmor %vm675_vm13, %vm676_vm14 }
 0x131   :  { %v1374_v17 = vadd.f32 1e-12, %v360_v51  ;;  %v1376_v1 = vadd.f32 1e-12, %v314_v34  ;;  %v346_v60 = vpop.xlane.xlu0 %345  ;;  %v671_v8 = vmul.f32 %v1359_v47, %v670_v26  ;;  %v1381_v50 = vpop.eup %940  ;;  %v737_v14 = vmul.f32 %v588_v35, %v1121_v36 }
 0x132   :  { %v434_v61 = vmul.f32 %v1324_v13, %v433_v55  ;;  %v443_v37 = vsub.f32 1.5, %v442_v38  ;;  %v590_v12 = vmul.f32 %v1381_v50, %v1340_v52  ;;  %v1394_v30 = vpop.eup %942  ;;  %v1399_v23 = vadd.f32 1e-12, %v346_v60 }
 0x133   :  { %946 = vrsqrt.f32 %v1374_v17  ;;  %v672_v9 = vmul.f32 0.5, %v671_v8  ;;  %769 = vst [vmem:[#allocation2 + $0x90] sm:$0xff] %v737_v14  ;;  %v600_v31 = vmul.f32 %v1394_v30, %v1342_v53  ;;  %v1405_v3 = vpop.eup %944  ;;  %vm525_vm2 = vweird.f32 %v1354_v21 }
 0x134   :  { %v438_v7 = vsel %vm437_vm11, %v1324_v13, %v434_v61  ;;  %948 = vrsqrt.f32 %v1376_v1  ;;  %v444_v18 = vmul.f32 %v1349_v22, %v443_v37  ;;  %v591_v13 = vmul.f32 %v1381_v50, %v590_v12 }
 0x135   :  { %v722_v36 = vmul.f32 %v438_v7, %v1127_v39  ;;  %v673_v28 = vsub.f32 1.5, %v672_v9  ;;  %950 = vrsqrt.f32 %v1399_v23  ;;  %v601_v41 = vmul.f32 %v1394_v30, %v600_v31 }
 0x136   :  { %v448_v39 = vsel %vm447_vm15, %v1349_v22, %v444_v18  ;;  %v592_v25 = vmul.f32 0.5, %v591_v13  ;;  %vm596_vm4 = vweird.f32 %v1381_v50  ;;  %v520_v22 = vmul.f32 %v1405_v3, %v1354_v21 }
 0x137   :  { %754 = vst [vmem:[#allocation2 + $0x18] sm:$0xff] %v722_v36  ;;  %v674_v27 = vmul.f32 %v1359_v47, %v673_v28  ;;  %v723_v59 = vmul.f32 %v448_v39, %v1139_v45  ;;  %v602_v43 = vmul.f32 0.5, %v601_v41  ;;  %vm606_vm5 = vweird.f32 %v1394_v30  ;;  %vm597_vm6 = vmor %vm595_vm0, %vm596_vm4 }
 0x138   :  { %v330_v19 = vpop.xlane.xlu1 %329  ;;  %v332_v20 = vpop.xlane.xlu2 %331  ;;  %v593_v42 = vsub.f32 1.5, %v592_v25  ;;  %v521_v55 = vmul.f32 %v1405_v3, %v520_v22  ;;  %vm526_vm7 = vweird.f32 %v1405_v3  ;;  %vm685_vm8 = vweird.f32 %v1374_v17  ;;  %vm607_vm9 = vmor %vm605_vm1, %vm606_vm5 }
 0x139   :  { %v1418_v24 = vpop.eup %946  ;;  %v1428_v29 = vadd.f32 1e-12, %v330_v19  ;;  %v316_v16 = vpop.xlane.xlu0 %315  ;;  %v678_v32 = vsel %vm677_vm3, %v1359_v47, %v674_v27  ;;  %755 = vst [vmem:[#allocation2 + $0x20] sm:$0xff] %v723_v59  ;;  %v603_v26 = vsub.f32 1.5, %v602_v43  ;;  %v1451_v60 = vadd.f32 1e-12, %v332_v20  ;;  %vm527_vm12 = vmor %vm525_vm2, %vm526_vm7 }
 0x13a   :  { %v680_v45 = vmul.f32 %v1418_v24, %v1374_v17  ;;  %v1433_v40 = vpop.eup %948  ;;  %v746_v2 = vmul.f32 %v678_v32, %v1141_v46  ;;  %v594_v33 = vmul.f32 %v1381_v50, %v593_v42  ;;  %v522_v46 = vmul.f32 0.5, %v521_v55 }
 0x13b   :  { %952 = vrsqrt.f32 %v1428_v29  ;;  %v450_v51 = vmul.f32 %v1433_v40, %v1376_v1  ;;  %v1443_v34 = vpop.eup %950  ;;  %v604_v61 = vmul.f32 %v1394_v30, %v603_v26  ;;  %vm686_vm10 = vweird.f32 %v1418_v24 }
 0x13c   :  { %v681_v47 = vmul.f32 %v1418_v24, %v680_v45  ;;  %778 = vst [vmem:[#allocation2 + $0xd8] sm:$0xff] %v746_v2  ;;  %v598_v35 = vsel %vm597_vm6, %v1381_v50, %v594_v33  ;;  %v523_v52 = vsub.f32 1.5, %v522_v46  ;;  %v610_v7 = vmul.f32 %v1443_v34, %v1399_v23  ;;  %vm687_vm14 = vmor %vm685_vm8, %vm686_vm10 }
 0x13d   :  { %v451_v8 = vmul.f32 %v1433_v40, %v450_v51  ;;  %v738_v14 = vmul.f32 %v598_v35, %v1137_v44  ;;  %v608_v50 = vsel %vm607_vm9, %v1394_v30, %v604_v61  ;;  %954 = vrsqrt.f32 %v1451_v60 }
 0x13e   :  { %v682_v38 = vmul.f32 0.5, %v681_v47  ;;  %v739_v53 = vmul.f32 %v608_v50, %v1147_v49  ;;  %v524_v18 = vmul.f32 %v1405_v3, %v523_v52  ;;  %vm455_vm11 = vweird.f32 %v1376_v1 }
 0x13f   :  { %v452_v9 = vmul.f32 0.5, %v451_v8  ;;  %770 = vst [vmem:[#allocation2 + $0x98] sm:$0xff] %v738_v14  ;;  %v611_v28 = vmul.f32 %v1443_v34, %v610_v7  ;;  %vm456_vm13 = vweird.f32 %v1433_v40  ;;  %v1485_v25 = vadd.f32 1e-12, %v316_v16 }
 0x140   :  { %v683_v37 = vsub.f32 1.5, %v682_v38  ;;  %v348_v12 = vpop.xlane.xlu1 %347  ;;  %v350_v36 = vpop.xlane.xlu2 %349  ;;  %771 = vst [vmem:[#allocation2 + $0xa0] sm:$0xff] %v739_v53  ;;  %v528_v39 = vsel %vm527_vm12, %v1405_v3, %v524_v18  ;;  %vm457_vm15 = vmor %vm455_vm11, %vm456_vm13  ;;  %vm616_vm0 = vweird.f32 %v1443_v34  ;;  %vm615_vm1 = vweird.f32 %v1399_v23 }
 0x141   :  { %v1466_v44 = vpop.eup %952  ;;  %v334_v13 = vpop.xlane.xlu0 %333  ;;  %v453_v31 = vsub.f32 1.5, %v452_v9  ;;  %v612_v27 = vmul.f32 0.5, %v611_v28  ;;  %v1487_v21 = vadd.f32 1e-12, %v348_v12  ;;  %v731_v41 = vmul.f32 %v528_v39, %v1145_v48  ;;  %vm617_vm2 = vmor %vm615_vm1, %vm616_vm0 }
 0x142   :  { %v684_v30 = vmul.f32 %v1418_v24, %v683_v37  ;;  %v530_v49 = vmul.f32 %v1466_v44, %v1428_v29  ;;  %956 = vrsqrt.f32 %v1485_v25  ;;  %vm536_vm3 = vweird.f32 %v1466_v44 }
 0x143   :  { %v454_v20 = vmul.f32 %v1433_v40, %v453_v31  ;;  %v613_v17 = vsub.f32 1.5, %v612_v27  ;;  %v955_v22 = vpop.eup %954  ;;  %763 = vst [vmem:[#allocation2 + $0x60] sm:$0xff] %v731_v41  ;;  %958 = vrsqrt.f32 %v1487_v21  ;;  %v1505_v42 = vadd.f32 1e-12, %v350_v36 }
 0x144   :  { %v688_v19 = vsel %vm687_vm14, %v1418_v24, %v684_v30  ;;  %v531_v59 = vmul.f32 %v1466_v44, %v530_v49  ;;  %v540_v1 = vmul.f32 %v955_v22, %v1451_v60  ;;  %v1507_v43 = vadd.f32 1e-12, %v334_v13 }
 0x145   :  { %v747_v3 = vmul.f32 %v688_v19, %v1165_v58  ;;  %v458_v48 = vsel %vm457_vm15, %v1433_v40, %v454_v20  ;;  %v614_v58 = vmul.f32 %v1443_v34, %v613_v17  ;;  %vm535_vm4 = vweird.f32 %v1428_v29 }
 0x146   :  { %v532_v16 = vmul.f32 0.5, %v531_v59  ;;  %v724_v24 = vmul.f32 %v458_v48, %v1163_v57  ;;  %v541_v57 = vmul.f32 %v955_v22, %v540_v1  ;;  %960 = vrsqrt.f32 %v1505_v42  ;;  %vm537_vm5 = vmor %vm535_vm4, %vm536_vm3 }
 0x147   :  { %779 = vst [vmem:[#allocation2 + $0xe0] sm:$0xff] %v747_v3  ;;  %v618_v2 = vsel %vm617_vm2, %v1443_v34, %v614_v58  ;;  %962 = vrsqrt.f32 %v1507_v43  ;;  %vm545_vm6 = vweird.f32 %v1451_v60  ;;  %vm546_vm7 = vweird.f32 %v955_v22 }
 0x148   :  { %v533_v32 = vsub.f32 1.5, %v532_v16  ;;  %v362_v45 = vpop.xlane.xlu2 %361  ;;  %v318_v40 = vpop.xlane.xlu1 %317  ;;  %756 = vst [vmem:[#allocation2 + $0x28] sm:$0xff] %v724_v24  ;;  %v740_v23 = vmul.f32 %v618_v2, %v1157_v54  ;;  %v542_v51 = vmul.f32 0.5, %v541_v57  ;;  %vm547_vm8 = vmor %vm545_vm6, %vm546_vm7  ;;  %vm465_vm9 = vweird.f32 %v1485_v25 }
 0x149   :  { %v1511_v55 = vadd.f32 1e-12, %v362_v45  ;;  %v1516_v26 = vadd.f32 1e-12, %v318_v40  ;;  %v957_v47 = vpop.eup %956  ;;  %v364_v34 = vpop.xlane.xlu0 %363  ;;  %vm625_vm10 = vweird.f32 %v1487_v21  ;;  %vm635_vm1 = vweird.f32 %v1505_v42 }
 0x14a   :  { %v534_v33 = vmul.f32 %v1466_v44, %v533_v32  ;;  %v959_v29 = vpop.eup %958  ;;  %772 = vst [vmem:[#allocation2 + $0xa8] sm:$0xff] %v740_v23  ;;  %v460_v54 = vmul.f32 %v957_v47, %v1485_v25  ;;  %v543_v61 = vsub.f32 1.5, %v542_v51  ;;  %v1528_v14 = vadd.f32 1e-12, %v364_v34 }
 0x14b   :  { %964 = vrsqrt.f32 %v1511_v55  ;;  %v620_v38 = vmul.f32 %v959_v29, %v1487_v21  ;;  %vm466_vm11 = vweird.f32 %v957_v47  ;;  %vm626_vm12 = vweird.f32 %v959_v29 }
 0x14c   :  { %v538_v46 = vsel %vm537_vm5, %v1466_v44, %v534_v33  ;;  %v461_v8 = vmul.f32 %v957_v47, %v460_v54  ;;  %966 = vrsqrt.f32 %v1516_v26  ;;  %v544_v52 = vmul.f32 %v955_v22, %v543_v61  ;;  %v1530_v50 = vpop.eup %960  ;;  %vm467_vm14 = vmor %vm465_vm9, %vm466_vm11 }
 0x14d   :  { %v732_v35 = vmul.f32 %v538_v46, %v1161_v56  ;;  %v621_v7 = vmul.f32 %v959_v29, %v620_v38  ;;  %968 = vrsqrt.f32 %v1528_v14  ;;  %v1534_v56 = vpop.eup %962  ;;  %v630_v12 = vmul.f32 %v1530_v50, %v1505_v42  ;;  %vm627_vm15 = vmor %vm625_vm10, %vm626_vm12 }
 0x14e   :  { %v462_v60 = vmul.f32 0.5, %v461_v8  ;;  %v548_v37 = vsel %vm547_vm8, %v955_v22, %v544_v52  ;;  %v550_v28 = vmul.f32 %v1534_v56, %v1507_v43  ;;  %vm636_vm13 = vweird.f32 %v1530_v50 }
 0x14f   :  { %764 = vst [vmem:[#allocation2 + $0x68] sm:$0xff] %v732_v35  ;;  %v622_v9 = vmul.f32 0.5, %v621_v7  ;;  %v733_v53 = vmul.f32 %v548_v37, %v1175_v63  ;;  %v631_v30 = vmul.f32 %v1530_v50, %v630_v12  ;;  %vm556_vm0 = vweird.f32 %v1534_v56  ;;  %vm637_vm3 = vmor %vm635_vm1, %vm636_vm13 }
 0x150   :  { %v366_v36 = vpop.xlane.xlu1 %365  ;;  %v463_v18 = vsub.f32 1.5, %v462_v60  ;;  %v551_v27 = vmul.f32 %v1534_v56, %v550_v28  ;;  %vm555_vm4 = vweird.f32 %v1507_v43  ;;  %vm695_vm6 = vweird.f32 %v1511_v55 }
 0x151   :  { %v965_v44 = vpop.eup %964  ;;  %v623_v13 = vsub.f32 1.5, %v622_v9  ;;  %765 = vst [vmem:[#allocation2 + $0x70] sm:$0xff] %v733_v53  ;;  %v1548_v63 = vadd.f32 1e-12, %v366_v36  ;;  %v632_v19 = vmul.f32 0.5, %v631_v30  ;;  %vm557_vm5 = vmor %vm555_vm4, %vm556_vm0  ;;  %vm475_vm9 = vweird.f32 %v1516_v26 }
 0x152   :  { %v690_v31 = vmul.f32 %v965_v44, %v1511_v55  ;;  %v1544_v49 = vpop.eup %966  ;;  %v464_v39 = vmul.f32 %v957_v47, %v463_v18  ;;  %v552_v22 = vmul.f32 0.5, %v551_v27  ;;  %vm696_vm2 = vweird.f32 %v965_v44 }
 0x153   :  { %v624_v41 = vmul.f32 %v959_v29, %v623_v13  ;;  %v470_v59 = vmul.f32 %v1544_v49, %v1516_v26  ;;  %v969_v3 = vpop.eup %968  ;;  %970 = vrsqrt.f32 %v1548_v63  ;;  %v633_v16 = vsub.f32 1.5, %v632_v19  ;;  %vm697_vm8 = vmor %vm695_vm6, %vm696_vm2 }
 0x154   :  { %v691_v20 = vmul.f32 %v965_v44, %v690_v31  ;;  %v468_v17 = vsel %vm467_vm14, %v957_v47, %v464_v39  ;;  %v553_v1 = vsub.f32 1.5, %v552_v22  ;;  %v700_v45 = vmul.f32 %v969_v3, %v1528_v14 }
 0x155   :  { %v725_v25 = vmul.f32 %v468_v17, %v1177_v0  ;;  %v628_v48 = vsel %vm627_vm15, %v959_v29, %v624_v41  ;;  %v471_v32 = vmul.f32 %v1544_v49, %v470_v59  ;;  %v634_v21 = vmul.f32 %v1530_v50, %v633_v16 }
 0x156   :  { %v692_v24 = vmul.f32 0.5, %v691_v20  ;;  %v741_v58 = vmul.f32 %v628_v48, %v1173_v62  ;;  %v554_v0 = vmul.f32 %v1534_v56, %v553_v1  ;;  %v701_v2 = vmul.f32 %v969_v3, %v700_v45 }
 0x157   :  { %757 = vst [vmem:[#allocation2 + $0x30] sm:$0xff] %v725_v25  ;;  %v472_v62 = vmul.f32 0.5, %v471_v32  ;;  %v638_v57 = vsel %vm637_vm3, %v1530_v50, %v634_v21  ;;  %vm476_vm7 = vweird.f32 %v1544_v49  ;;  %vm706_vm10 = vweird.f32 %v969_v3 }
 0x158   :  { %v693_v40 = vsub.f32 1.5, %v692_v24  ;;  %773 = vst [vmem:[#allocation2 + $0xb0] sm:$0xff] %v741_v58  ;;  %v742_v33 = vmul.f32 %v638_v57, %v1187_v5  ;;  %v558_v47 = vsel %vm557_vm5, %v1534_v56, %v554_v0  ;;  %v702_v51 = vmul.f32 0.5, %v701_v2  ;;  %vm477_vm11 = vmor %vm475_vm9, %vm476_vm7 }
 0x159   :  { %v971_v42 = vpop.eup %970  ;;  %v473_v43 = vsub.f32 1.5, %v472_v62  ;;  %v734_v34 = vmul.f32 %v558_v47, %v1189_v6  ;;  %vm705_vm12 = vweird.f32 %v1528_v14  ;;  %vm715_vm15 = vweird.f32 %v1548_v63 }
 0x15a   :  { %v694_v23 = vmul.f32 %v965_v44, %v693_v40  ;;  %v710_v46 = vmul.f32 %v971_v42, %v1548_v63  ;;  %774 = vst [vmem:[#allocation2 + $0xb8] sm:$0xff] %v742_v33  ;;  %v703_v35 = vsub.f32 1.5, %v702_v51  ;;  %vm707_vm13 = vmor %vm705_vm12, %vm706_vm10  ;;  %vm716_vm14 = vweird.f32 %v971_v42 }
 0x15b   :  { %v474_v54 = vmul.f32 %v1544_v49, %v473_v43  ;;  %766 = vst [vmem:[#allocation2 + $0x78] sm:$0xff] %v734_v34  ;;  %vm717_vm0 = vmor %vm715_vm15, %vm716_vm14 }
 0x15c   :  { %v698_v29 = vsel %vm697_vm8, %v965_v44, %v694_v23  ;;  %v711_v5 = vmul.f32 %v971_v42, %v710_v46  ;;  %v704_v61 = vmul.f32 %v969_v3, %v703_v35 }
 0x15d   :  { %v748_v55 = vmul.f32 %v698_v29, %v1185_v4  ;;  %v478_v6 = vsel %vm477_vm11, %v1544_v49, %v474_v54 }
 0x15e   :  { %v726_v26 = vmul.f32 %v478_v6, %v1199_v11  ;;  %v712_v38 = vmul.f32 0.5, %v711_v5  ;;  %v708_v4 = vsel %vm707_vm13, %v969_v3, %v704_v61 }
 0x15f   :  { %780 = vst [vmem:[#allocation2 + $0xe8] sm:$0xff] %v748_v55  ;;  %v749_v8 = vmul.f32 %v708_v4, %v1197_v10 }
 0x160   :  { %758 = vst [vmem:[#allocation2 + $0x38] sm:$0xff] %v726_v26  ;;  %v713_v52 = vsub.f32 1.5, %v712_v38 }
 0x161   :  { %781 = vst [vmem:[#allocation2 + $0xf0] sm:$0xff] %v749_v8 }
 0x162   :  { %v714_v7 = vmul.f32 %v971_v42, %v713_v52 }
 0x164   :  { %v718_v11 = vsel %vm717_vm0, %v971_v42, %v714_v7 }
 0x165   :  { %v750_v14 = vmul.f32 %v718_v11, %v1207_v15 }
 0x167   :  { %782 = vst [vmem:[#allocation2 + $0xf8] sm:$0xff] %v750_v14 }
 0x168   :  { %795 = dma.vmem_to_hbm [thread:$0]  %s788_s14, 4096, %s790_s17, [#allocation3], %s999_s18, %s999_s18, %s1000_s1  }
 0x169   :  { %996 = dma.done.wait [#allocation3], 4096  }
 0x16a   :  { %997 = vsyncadd [#allocation3], 4294963200 }
 0x16b   :  { %800 = vsyncpa [#allocation3], 1 }

// kernel: tpu_custom_call.1
= control target key start
LH: loop header
LB: loop body
LE: loop exit
PB: predicated region body
PF: predicated region fallthrough
CT: control target
= control target key end

     0   :  { %vm133_vm0 = vcmask 130048   ;;  %s1593_s0 = inlined_call_operand.vmem [shape: bf16[256,16], index: 0, kind: input, shape index: {}]   ;;  %s1594_s1 = inlined_call_operand.vmem [shape: bf16[16,128], index: 1, kind: input, shape index: {}]   ;;  %s1595_s2 = inlined_call_operand.hbm [shape: f32[256,128], index: 2, kind: output, shape index: {}]  }
   0x1   :  { %v901_v0 = vld [vmem:[%s1594_s1] sm:$0xff] }
   0x2   :  { %v885_v1 = vld [vmem:[%s1593_s0] sm:$0xff]  ;;  %189 = vmatpush.bf16.msra.mxu0 %v901_v0  ;;  %902 = vmatpush.bf16.msra.mxu1 %v901_v0 }
   0x3   :  { %v889_v2 = vld [vmem:[%s1593_s0 + $0x20] sm:$0xff]  ;;  %903 = vmatpush.bf16.msra.mxu2 %v901_v0  ;;  %904 = vmatpush.bf16.msra.mxu3 %v901_v0 }
   0x4   :  { %v893_v3 = vld [vmem:[%s1593_s0 + $0x40] sm:$0xff] }
   0x5   :  { %v897_v4 = vld [vmem:[%s1593_s0 + $0x60] sm:$0xff] }
   0x6   :  { %7 = vsyncpa [#allocation3], 0  ;;  %869 = vmatmul.msk.bf16.vlgmr.msra.gmra.mxu0 %vm133_vm0, %v885_v1  ;;  %873 = vmatmul.msk.bf16.vlgmr.msra.gmra.mxu1 %vm133_vm0, %v889_v2  ;;  %v886_v5 = vld [vmem:[%s1593_s0 + $0x8] sm:$0xff]  ;;  %v887_v9 = vld [vmem:[%s1593_s0 + $0x10] sm:$0xff]  ;;  %s789_s17 = sshll.u32 %s1595_s2, 4  ;;  %s999_s18 = smov 128   ;;  %s790_s17 = int_to_ptr.hbm [resolvable:$true] %s789_s17 }
   0x7   :  { %877 = vmatmul.msk.bf16.vlgmr.msra.gmra.mxu2 %vm133_vm0, %v893_v3  ;;  %881 = vmatmul.msk.bf16.vlgmr.msra.gmra.mxu3 %vm133_vm0, %v897_v4  ;;  %v890_v6 = vld [vmem:[%s1593_s0 + $0x28] sm:$0xff]  ;;  %v891_v10 = vld [vmem:[%s1593_s0 + $0x30] sm:$0xff]  ;;  %v888_v13 = vld [vmem:[%s1593_s0 + $0x18] sm:$0xff]  ;;  %s1000_s1 = smov 8  }
   0x8   :  { %v898_v7 = vld [vmem:[%s1593_s0 + $0x68] sm:$0xff]  ;;  %v895_v11 = vld [vmem:[%s1593_s0 + $0x50] sm:$0xff]  ;;  %v892_v14 = vld [vmem:[%s1593_s0 + $0x38] sm:$0xff] }
   0x9   :  { %v894_v8 = vld [vmem:[%s1593_s0 + $0x48] sm:$0xff]  ;;  %v899_v12 = vld [vmem:[%s1593_s0 + $0x70] sm:$0xff]  ;;  %v896_v15 = vld [vmem:[%s1593_s0 + $0x58] sm:$0xff] }
   0xa   :  { %v900_v16 = vld [vmem:[%s1593_s0 + $0x78] sm:$0xff]  ;;  %s998_s0 = smov [#allocation2]  }
   0xb   :  { %s787_s14 = sshll.u32 %s998_s0, 4  ;;  %s788_s14 = int_to_ptr.vmem [resolvable:$true] %s787_s14 }
  0x16   :  { %870 = vmatmul.msk.bf16.gmra.mxu0 %vm133_vm0, %v886_v5  ;;  %874 = vmatmul.msk.bf16.gmra.mxu1 %vm133_vm0, %v890_v6 }
  0x17   :  { %882 = vmatmul.msk.bf16.gmra.mxu3 %vm133_vm0, %v898_v7  ;;  %878 = vmatmul.msk.bf16.gmra.mxu2 %vm133_vm0, %v894_v8 }
  0x26   :  { %871 = vmatmul.msk.bf16.gmra.mxu0 %vm133_vm0, %v887_v9  ;;  %875 = vmatmul.msk.bf16.gmra.mxu1 %vm133_vm0, %v891_v10 }
  0x27   :  { %879 = vmatmul.msk.bf16.gmra.mxu2 %vm133_vm0, %v895_v11  ;;  %883 = vmatmul.msk.bf16.gmra.mxu3 %vm133_vm0, %v899_v12 }
  0x36   :  { %872 = vmatmul.msk.bf16.gmra.mxu0 %vm133_vm0, %v888_v13  ;;  %876 = vmatmul.msk.bf16.gmra.mxu1 %vm133_vm0, %v892_v14 }
  0x37   :  { %880 = vmatmul.msk.bf16.gmra.mxu2 %vm133_vm0, %v896_v15  ;;  %884 = vmatmul.msk.bf16.gmra.mxu3 %vm133_vm0, %v900_v16 }
  0x83   :  { %v1083_v17 = vpop.f32.mrf.mxu0  ;;  %v1085_v18 = vpop.f32.mrf.mxu1 }
  0x84   :  { %v279_v19 = vmul.f32 %v1085_v18, %v1085_v18  ;;  %v271_v20 = vmul.f32 %v1083_v17, %v1083_v17 }
  0x86   :  { %319 = vadd.xlane.f32.xlu2 %v279_v19  ;;  %303 = vadd.xlane.f32.xlu0 %v271_v20 }
  0x8a   :  { %v1091_v21 = vpop.f32.mrf.mxu2  ;;  %v1093_v22 = vpop.f32.mrf.mxu3 }
  0x8b   :  { %v1095_v23 = vpop.f32.mrf.mxu0  ;;  %v287_v24 = vmul.f32 %v1091_v21, %v1091_v21  ;;  %v1099_v25 = vpop.f32.mrf.mxu1  ;;  %v295_v26 = vmul.f32 %v1093_v22, %v1093_v22 }
  0x8c   :  { %v272_v32 = vmul.f32 %v1095_v23, %v1095_v23  ;;  %v280_v38 = vmul.f32 %v1099_v25, %v1099_v25 }
  0x8d   :  { %335 = vadd.xlane.f32.xlu1 %v287_v24 }
  0x8e   :  { %351 = vadd.xlane.f32.xlu0 %v295_v26 }
  0x92   :  { %v1103_v27 = vpop.f32.mrf.mxu2  ;;  %v1105_v28 = vpop.f32.mrf.mxu3 }
  0x93   :  { %v296_v29 = vmul.f32 %v1105_v28, %v1105_v28  ;;  %v288_v30 = vmul.f32 %v1103_v27, %v1103_v27  ;;  %v1111_v31 = vpop.f32.mrf.mxu0  ;;  %v1115_v33 = vpop.f32.mrf.mxu1 }
  0x94   :  { %v273_v34 = vmul.f32 %v1111_v31, %v1111_v31  ;;  %v281_v42 = vmul.f32 %v1115_v33, %v1115_v33 }
  0x95   :  { %353 = vadd.xlane.f32.xlu1 %v296_v29  ;;  %337 = vadd.xlane.f32.xlu2 %v288_v30 }
  0x96   :  { %305 = vadd.xlane.f32.xlu0 %v272_v32 }
  0x9a   :  { %v1119_v35 = vpop.f32.mrf.mxu3  ;;  %v1121_v36 = vpop.f32.mrf.mxu2 }
  0x9b   :  { %v297_v37 = vmul.f32 %v1119_v35, %v1119_v35  ;;  %v1127_v39 = vpop.f32.mrf.mxu0  ;;  %v1129_v40 = vpop.f32.mrf.mxu1  ;;  %v289_v43 = vmul.f32 %v1121_v36, %v1121_v36 }
  0x9c   :  { %v282_v41 = vmul.f32 %v1129_v40, %v1129_v40  ;;  %v274_v50 = vmul.f32 %v1127_v39, %v1127_v39 }
  0x9d   :  { %355 = vadd.xlane.f32.xlu2 %v297_v37  ;;  %307 = vadd.xlane.f32.xlu1 %v273_v34 }
  0x9e   :  { %321 = vadd.xlane.f32.xlu0 %v280_v38 }
  0xa2   :  { %v1137_v44 = vpop.f32.mrf.mxu2  ;;  %v1141_v46 = vpop.f32.mrf.mxu3 }
  0xa3   :  { %v1139_v45 = vpop.f32.mrf.mxu0  ;;  %v1145_v48 = vpop.f32.mrf.mxu1  ;;  %v298_v51 = vmul.f32 %v1141_v46, %v1141_v46  ;;  %v290_v55 = vmul.f32 %v1137_v44, %v1137_v44 }
  0xa4   :  { %v275_v47 = vmul.f32 %v1139_v45, %v1139_v45  ;;  %v283_v53 = vmul.f32 %v1145_v48, %v1145_v48 }
  0xa5   :  { %325 = vadd.xlane.f32.xlu2 %v282_v41  ;;  %323 = vadd.xlane.f32.xlu1 %v281_v42 }
  0xa6   :  { %339 = vadd.xlane.f32.xlu0 %v289_v43 }
  0xaa   :  { %v1147_v49 = vpop.f32.mrf.mxu2  ;;  %v1165_v58 = vpop.f32.mrf.mxu3 }
  0xab   :  { %v291_v52 = vmul.f32 %v1147_v49, %v1147_v49  ;;  %v1161_v56 = vpop.f32.mrf.mxu1  ;;  %v1163_v57 = vpop.f32.mrf.mxu0  ;;  %v299_v59 = vmul.f32 %v1165_v58, %v1165_v58 }
  0xac   :  { %v276_v60 = vmul.f32 %v1163_v57, %v1163_v57  ;;  %v284_v3 = vmul.f32 %v1161_v56, %v1161_v56 }
  0xad   :  { %309 = vadd.xlane.f32.xlu1 %v274_v50  ;;  %311 = vadd.xlane.f32.xlu2 %v275_v47 }
  0xae   :  { %357 = vadd.xlane.f32.xlu0 %v298_v51 }
  0xb2   :  { %v1157_v54 = vpop.f32.mrf.mxu2  ;;  %v1185_v4 = vpop.f32.mrf.mxu3 }
  0xb3   :  { %v292_v61 = vmul.f32 %v1157_v54, %v1157_v54  ;;  %v1175_v63 = vpop.f32.mrf.mxu1  ;;  %v1177_v0 = vpop.f32.mrf.mxu0  ;;  %v300_v13 = vmul.f32 %v1185_v4, %v1185_v4 }
  0xb4   :  { %v285_v1 = vmul.f32 %v1175_v63, %v1175_v63  ;;  %v277_v2 = vmul.f32 %v1177_v0, %v1177_v0 }
  0xb5   :  { %341 = vadd.xlane.f32.xlu1 %v290_v55  ;;  %343 = vadd.xlane.f32.xlu2 %v291_v52 }
  0xb6   :  { %327 = vadd.xlane.f32.xlu0 %v283_v53 }
  0xba   :  { %v1173_v62 = vpop.f32.mrf.mxu2  ;;  %v1197_v10 = vpop.f32.mrf.mxu3 }
  0xbb   :  { %v1189_v6 = vpop.f32.mrf.mxu1  ;;  %v293_v8 = vmul.f32 %v1173_v62, %v1173_v62  ;;  %v1199_v11 = vpop.f32.mrf.mxu0  ;;  %v301_v14 = vmul.f32 %v1197_v10, %v1197_v10 }
  0xbc   :  { %v286_v9 = vmul.f32 %v1189_v6, %v1189_v6  ;;  %v278_v12 = vmul.f32 %v1199_v11, %v1199_v11 }
  0xbd   :  { %359 = vadd.xlane.f32.xlu1 %v299_v59  ;;  %313 = vadd.xlane.f32.xlu2 %v276_v60 }
  0xbe   :  { %345 = vadd.xlane.f32.xlu0 %v292_v61 }
  0xc2   :  { %v1187_v5 = vpop.f32.mrf.mxu2  ;;  %v1207_v15 = vpop.f32.mrf.mxu3 }
  0xc3   :  { %v294_v7 = vmul.f32 %v1187_v5, %v1187_v5  ;;  %v302_v16 = vmul.f32 %v1207_v15, %v1207_v15 }
  0xc5   :  { %329 = vadd.xlane.f32.xlu1 %v284_v3  ;;  %331 = vadd.xlane.f32.xlu2 %v285_v1 }
  0xc6   :  { %315 = vadd.xlane.f32.xlu0 %v277_v2 }
  0xcd   :  { %347 = vadd.xlane.f32.xlu1 %v293_v8  ;;  %349 = vadd.xlane.f32.xlu2 %v294_v7 }
  0xce   :  { %333 = vadd.xlane.f32.xlu0 %v286_v9 }
  0xd5   :  { %361 = vadd.xlane.f32.xlu2 %v300_v13  ;;  %317 = vadd.xlane.f32.xlu1 %v278_v12 }
  0xd6   :  { %363 = vadd.xlane.f32.xlu0 %v301_v14 }
  0xdd   :  { %365 = vadd.xlane.f32.xlu1 %v302_v16 }
  0xf9   :  { %v320_v19 = vpop.xlane.xlu2 %319  ;;  %v304_v20 = vpop.xlane.xlu0 %303 }
  0xfa   :  { %v375_v24 = vadd.f32 1e-12, %v320_v19  ;;  %v367_v26 = vadd.f32 1e-12, %v304_v20 }
  0xfc   :  { %908 = vrsqrt.f32 %v375_v24  ;;  %vm485_vm1 = vweird.f32 %v375_v24  ;;  %vm405_vm3 = vweird.f32 %v367_v26 }
  0xfd   :  { %910 = vrsqrt.f32 %v367_v26 }
 0x100   :  { %v336_v29 = vpop.xlane.xlu1 %335 }
 0x101   :  { %v383_v30 = vadd.f32 1e-12, %v336_v29  ;;  %v352_v32 = vpop.xlane.xlu0 %351 }
 0x102   :  { %v909_v34 = vpop.eup %908  ;;  %v1211_v37 = vadd.f32 1e-12, %v352_v32 }
 0x103   :  { %v911_v38 = vpop.eup %910  ;;  %v480_v41 = vmul.f32 %v909_v34, %v375_v24  ;;  %912 = vrsqrt.f32 %v383_v30  ;;  %vm486_vm2 = vweird.f32 %v909_v34  ;;  %vm565_vm8 = vweird.f32 %v383_v30 }
 0x104   :  { %v400_v42 = vmul.f32 %v911_v38, %v367_v26  ;;  %914 = vrsqrt.f32 %v1211_v37  ;;  %vm487_vm4 = vmor %vm485_vm1, %vm486_vm2  ;;  %vm406_vm5 = vweird.f32 %v911_v38  ;;  %vm645_vm10 = vweird.f32 %v1211_v37 }
 0x105   :  { %v481_v43 = vmul.f32 %v909_v34, %v480_v41  ;;  %vm407_vm6 = vmor %vm405_vm3, %vm406_vm5 }
 0x106   :  { %v401_v47 = vmul.f32 %v911_v38, %v400_v42 }
 0x107   :  { %v482_v50 = vmul.f32 0.5, %v481_v43 }
 0x108   :  { %v402_v51 = vmul.f32 0.5, %v401_v47  ;;  %v354_v52 = vpop.xlane.xlu1 %353  ;;  %v338_v53 = vpop.xlane.xlu2 %337 }
 0x109   :  { %v913_v55 = vpop.eup %912  ;;  %v483_v59 = vsub.f32 1.5, %v482_v50  ;;  %v1214_v60 = vadd.f32 1e-12, %v354_v52  ;;  %v1216_v61 = vadd.f32 1e-12, %v338_v53  ;;  %v306_v1 = vpop.xlane.xlu0 %305 }
 0x10a   :  { %v915_v2 = vpop.eup %914  ;;  %v403_v3 = vsub.f32 1.5, %v402_v51  ;;  %v560_v7 = vmul.f32 %v913_v55, %v383_v30  ;;  %v1218_v8 = vadd.f32 1e-12, %v306_v1  ;;  %vm566_vm7 = vweird.f32 %v913_v55 }
 0x10b   :  { %v484_v9 = vmul.f32 %v909_v34, %v483_v59  ;;  %v640_v12 = vmul.f32 %v915_v2, %v1211_v37  ;;  %916 = vrsqrt.f32 %v1214_v60  ;;  %vm646_vm9 = vweird.f32 %v915_v2  ;;  %vm567_vm11 = vmor %vm565_vm8, %vm566_vm7 }
 0x10c   :  { %v404_v13 = vmul.f32 %v911_v38, %v403_v3  ;;  %v561_v14 = vmul.f32 %v913_v55, %v560_v7  ;;  %918 = vrsqrt.f32 %v1216_v61  ;;  %vm647_vm12 = vmor %vm645_vm10, %vm646_vm9  ;;  %vm655_vm13 = vweird.f32 %v1214_v60 }
 0x10d   :  { %v488_v16 = vsel %vm487_vm4, %v909_v34, %v484_v9  ;;  %v641_v19 = vmul.f32 %v915_v2, %v640_v12  ;;  %920 = vrsqrt.f32 %v1218_v8  ;;  %vm575_vm2 = vweird.f32 %v1216_v61 }
 0x10e   :  { %v727_v20 = vmul.f32 %v488_v16, %v1085_v18  ;;  %v408_v24 = vsel %vm407_vm6, %v911_v38, %v404_v13  ;;  %v562_v29 = vmul.f32 0.5, %v561_v14  ;;  %vm415_vm3 = vweird.f32 %v1218_v8 }
 0x10f   :  { %v719_v32 = vmul.f32 %v408_v24, %v1083_v17  ;;  %v642_v41 = vmul.f32 0.5, %v641_v19 }
 0x110   :  { %759 = vst [vmem:[#allocation2 + $0x40] sm:$0xff] %v727_v20  ;;  %v563_v42 = vsub.f32 1.5, %v562_v29  ;;  %v356_v43 = vpop.xlane.xlu2 %355  ;;  %v308_v47 = vpop.xlane.xlu1 %307 }
 0x111   :  { %v917_v50 = vpop.eup %916  ;;  %751 = vst [vmem:[#allocation2] sm:$0xff] %v719_v32  ;;  %v643_v26 = vsub.f32 1.5, %v642_v41  ;;  %v1227_v34 = vadd.f32 1e-12, %v356_v43  ;;  %v322_v51 = vpop.xlane.xlu0 %321  ;;  %v1231_v38 = vadd.f32 1e-12, %v308_v47 }
 0x112   :  { %v919_v52 = vpop.eup %918  ;;  %v564_v18 = vmul.f32 %v913_v55, %v563_v42  ;;  %v650_v17 = vmul.f32 %v917_v50, %v1214_v60  ;;  %v1236_v30 = vadd.f32 1e-12, %v322_v51  ;;  %vm656_vm14 = vweird.f32 %v917_v50 }
 0x113   :  { %v921_v53 = vpop.eup %920  ;;  %v644_v59 = vmul.f32 %v915_v2, %v643_v26  ;;  %v570_v1 = vmul.f32 %v919_v52, %v1216_v61  ;;  %922 = vrsqrt.f32 %v1227_v34  ;;  %vm576_vm15 = vweird.f32 %v919_v52  ;;  %vm657_vm1 = vmor %vm655_vm13, %vm656_vm14 }
 0x114   :  { %v568_v3 = vsel %vm567_vm11, %v913_v55, %v564_v18  ;;  %v651_v7 = vmul.f32 %v917_v50, %v650_v17  ;;  %v410_v37 = vmul.f32 %v921_v53, %v1218_v8  ;;  %924 = vrsqrt.f32 %v1231_v38  ;;  %vm577_vm4 = vmor %vm575_vm2, %vm576_vm15 }
 0x115   :  { %v735_v9 = vmul.f32 %v568_v3, %v1091_v21  ;;  %v648_v12 = vsel %vm647_vm12, %v915_v2, %v644_v59  ;;  %v571_v13 = vmul.f32 %v919_v52, %v570_v1  ;;  %926 = vrsqrt.f32 %v1236_v30 }
 0x116   :  { %v743_v14 = vmul.f32 %v648_v12, %v1093_v22  ;;  %v652_v16 = vmul.f32 0.5, %v651_v7  ;;  %v411_v19 = vmul.f32 %v921_v53, %v410_v37  ;;  %vm416_vm0 = vweird.f32 %v921_v53 }
 0x117   :  { %767 = vst [vmem:[#allocation2 + $0x80] sm:$0xff] %v735_v9  ;;  %v572_v20 = vmul.f32 0.5, %v571_v13  ;;  %vm417_vm5 = vmor %vm415_vm3, %vm416_vm0  ;;  %vm665_vm6 = vweird.f32 %v1227_v34  ;;  %vm425_vm8 = vweird.f32 %v1231_v38  ;;  %vm495_vm9 = vweird.f32 %v1236_v30 }
 0x118   :  { %775 = vst [vmem:[#allocation2 + $0xc0] sm:$0xff] %v743_v14  ;;  %v653_v55 = vsub.f32 1.5, %v652_v16  ;;  %v412_v24 = vmul.f32 0.5, %v411_v19  ;;  %v326_v29 = vpop.xlane.xlu2 %325  ;;  %v324_v21 = vpop.xlane.xlu1 %323 }
 0x119   :  { %v1245_v2 = vpop.eup %922  ;;  %v573_v32 = vsub.f32 1.5, %v572_v20  ;;  %v1247_v22 = vadd.f32 1e-12, %v326_v29  ;;  %v1249_v41 = vadd.f32 1e-12, %v324_v21  ;;  %v340_v42 = vpop.xlane.xlu0 %339 }
 0x11a   :  { %v654_v43 = vmul.f32 %v917_v50, %v653_v55  ;;  %v413_v47 = vsub.f32 1.5, %v412_v24  ;;  %v660_v26 = vmul.f32 %v1245_v2, %v1227_v34  ;;  %v1258_v18 = vpop.eup %924  ;;  %v1274_v14 = vadd.f32 1e-12, %v340_v42 }
 0x11b   :  { %v574_v51 = vmul.f32 %v919_v52, %v573_v32  ;;  %928 = vrsqrt.f32 %v1247_v22  ;;  %v1263_v3 = vpop.eup %926  ;;  %v420_v61 = vmul.f32 %v1258_v18, %v1231_v38  ;;  %vm666_vm7 = vweird.f32 %v1245_v2 }
 0x11c   :  { %v658_v17 = vsel %vm657_vm1, %v917_v50, %v654_v43  ;;  %v414_v59 = vmul.f32 %v921_v53, %v413_v47  ;;  %v661_v1 = vmul.f32 %v1245_v2, %v660_v26  ;;  %930 = vrsqrt.f32 %v1249_v41  ;;  %vm667_vm10 = vmor %vm665_vm6, %vm666_vm7 }
 0x11d   :  { %v744_v60 = vmul.f32 %v658_v17, %v1105_v28  ;;  %v578_v7 = vsel %vm577_vm4, %v919_v52, %v574_v51  ;;  %v490_v9 = vmul.f32 %v1263_v3, %v1236_v30  ;;  %v421_v13 = vmul.f32 %v1258_v18, %v420_v61 }
 0x11e   :  { %v736_v8 = vmul.f32 %v578_v7, %v1103_v27  ;;  %v418_v50 = vsel %vm417_vm5, %v921_v53, %v414_v59  ;;  %v662_v37 = vmul.f32 0.5, %v661_v1  ;;  %932 = vrsqrt.f32 %v1274_v14 }
 0x11f   :  { %776 = vst [vmem:[#allocation2 + $0xc8] sm:$0xff] %v744_v60  ;;  %v720_v12 = vmul.f32 %v418_v50, %v1095_v23  ;;  %v491_v27 = vmul.f32 %v1263_v3, %v490_v9  ;;  %v422_v19 = vmul.f32 0.5, %v421_v13  ;;  %vm426_vm11 = vweird.f32 %v1258_v18 }
 0x120   :  { %768 = vst [vmem:[#allocation2 + $0x88] sm:$0xff] %v736_v8  ;;  %v663_v28 = vsub.f32 1.5, %v662_v37  ;;  %v310_v52 = vpop.xlane.xlu1 %309  ;;  %v312_v53 = vpop.xlane.xlu2 %311  ;;  %vm496_vm12 = vweird.f32 %v1263_v3  ;;  %vm427_vm13 = vmor %vm425_vm8, %vm426_vm11  ;;  %vm515_vm14 = vweird.f32 %v1247_v22  ;;  %vm505_vm2 = vweird.f32 %v1249_v41 }
 0x121   :  { %v1279_v16 = vpop.eup %928  ;;  %752 = vst [vmem:[#allocation2 + $0x8] sm:$0xff] %v720_v12  ;;  %v1283_v23 = vadd.f32 1e-12, %v310_v52  ;;  %v358_v20 = vpop.xlane.xlu0 %357  ;;  %v492_v29 = vmul.f32 0.5, %v491_v27  ;;  %v423_v32 = vsub.f32 1.5, %v422_v19  ;;  %vm497_vm15 = vmor %vm495_vm9, %vm496_vm12  ;;  %vm585_vm4 = vweird.f32 %v1274_v14 }
 0x122   :  { %v1285_v55 = vpop.eup %930  ;;  %v664_v24 = vmul.f32 %v1245_v2, %v663_v28  ;;  %v510_v21 = vmul.f32 %v1279_v16, %v1247_v22  ;;  %v1305_v59 = vadd.f32 1e-12, %v312_v53  ;;  %vm516_vm0 = vweird.f32 %v1279_v16 }
 0x123   :  { %v500_v42 = vmul.f32 %v1285_v55, %v1249_v41  ;;  %934 = vrsqrt.f32 %v1283_v23  ;;  %v493_v47 = vsub.f32 1.5, %v492_v29  ;;  %v424_v34 = vmul.f32 %v1258_v18, %v423_v32  ;;  %vm517_vm3 = vmor %vm515_vm14, %vm516_vm0 }
 0x124   :  { %v668_v43 = vsel %vm667_vm10, %v1245_v2, %v664_v24  ;;  %v511_v26 = vmul.f32 %v1279_v16, %v510_v21  ;;  %v1311_v2 = vadd.f32 1e-12, %v358_v20  ;;  %v1313_v7 = vpop.eup %932  ;;  %936 = vrsqrt.f32 %v1305_v59 }
 0x125   :  { %v745_v51 = vmul.f32 %v668_v43, %v1119_v35  ;;  %v501_v17 = vmul.f32 %v1285_v55, %v500_v42  ;;  %v494_v1 = vmul.f32 %v1263_v3, %v493_v47  ;;  %v428_v35 = vsel %vm427_vm13, %v1258_v18, %v424_v34 }
 0x126   :  { %v512_v60 = vmul.f32 0.5, %v511_v26  ;;  %v721_v38 = vmul.f32 %v428_v35, %v1111_v31  ;;  %v580_v37 = vmul.f32 %v1313_v7, %v1274_v14  ;;  %vm506_vm1 = vweird.f32 %v1285_v55 }
 0x127   :  { %777 = vst [vmem:[#allocation2 + $0xd0] sm:$0xff] %v745_v51  ;;  %v502_v61 = vmul.f32 0.5, %v501_v17  ;;  %v498_v8 = vsel %vm497_vm15, %v1263_v3, %v494_v1  ;;  %938 = vrsqrt.f32 %v1311_v2  ;;  %vm507_vm5 = vmor %vm505_vm2, %vm506_vm1  ;;  %vm586_vm6 = vweird.f32 %v1313_v7 }
 0x128   :  { %v513_v50 = vsub.f32 1.5, %v512_v60  ;;  %v342_v9 = vpop.xlane.xlu1 %341  ;;  %v344_v12 = vpop.xlane.xlu2 %343  ;;  %v728_v30 = vmul.f32 %v498_v8, %v1099_v25  ;;  %753 = vst [vmem:[#allocation2 + $0x10] sm:$0xff] %v721_v38  ;;  %v581_v3 = vmul.f32 %v1313_v7, %v580_v37  ;;  %vm435_vm7 = vweird.f32 %v1283_v23  ;;  %vm587_vm9 = vmor %vm585_vm4, %vm586_vm6 }
 0x129   :  { %v1324_v13 = vpop.eup %934  ;;  %v503_v18 = vsub.f32 1.5, %v502_v61  ;;  %v328_v28 = vpop.xlane.xlu0 %327  ;;  %v1340_v52 = vadd.f32 1e-12, %v342_v9  ;;  %v1342_v53 = vadd.f32 1e-12, %v344_v12  ;;  %vm445_vm10 = vweird.f32 %v1305_v59 }
 0x12a   :  { %v514_v31 = vmul.f32 %v1279_v16, %v513_v50  ;;  %v430_v27 = vmul.f32 %v1324_v13, %v1283_v23  ;;  %760 = vst [vmem:[#allocation2 + $0x48] sm:$0xff] %v728_v30  ;;  %v582_v19 = vmul.f32 0.5, %v581_v3  ;;  %v1349_v22 = vpop.eup %936  ;;  %v1354_v21 = vadd.f32 1e-12, %v328_v28 }
 0x12b   :  { %v504_v25 = vmul.f32 %v1285_v55, %v503_v18  ;;  %940 = vrsqrt.f32 %v1340_v52  ;;  %v440_v43 = vmul.f32 %v1349_v22, %v1305_v59  ;;  %vm436_vm8 = vweird.f32 %v1324_v13 }
 0x12c   :  { %v518_v41 = vsel %vm517_vm3, %v1279_v16, %v514_v31  ;;  %v431_v20 = vmul.f32 %v1324_v13, %v430_v27  ;;  %v583_v32 = vsub.f32 1.5, %v582_v19  ;;  %942 = vrsqrt.f32 %v1342_v53  ;;  %vm437_vm11 = vmor %vm435_vm7, %vm436_vm8 }
 0x12d   :  { %v730_v24 = vmul.f32 %v518_v41, %v1129_v40  ;;  %v508_v29 = vsel %vm507_vm5, %v1285_v55, %v504_v25  ;;  %v1359_v47 = vpop.eup %938  ;;  %944 = vrsqrt.f32 %v1354_v21  ;;  %vm446_vm12 = vweird.f32 %v1349_v22 }
 0x12e   :  { %v729_v16 = vmul.f32 %v508_v29, %v1115_v33  ;;  %v432_v42 = vmul.f32 0.5, %v431_v20  ;;  %v584_v40 = vmul.f32 %v1313_v7, %v583_v32  ;;  %v441_v33 = vmul.f32 %v1349_v22, %v440_v43  ;;  %vm447_vm15 = vmor %vm445_vm10, %vm446_vm12 }
 0x12f   :  { %762 = vst [vmem:[#allocation2 + $0x58] sm:$0xff] %v730_v24  ;;  %v670_v26 = vmul.f32 %v1359_v47, %v1311_v2  ;;  %vm675_vm13 = vweird.f32 %v1311_v2  ;;  %vm676_vm14 = vweird.f32 %v1359_v47  ;;  %vm595_vm0 = vweird.f32 %v1340_v52 }
 0x130   :  { %761 = vst [vmem:[#allocation2 + $0x50] sm:$0xff] %v729_v16  ;;  %v433_v55 = vsub.f32 1.5, %v432_v42  ;;  %v360_v51 = vpop.xlane.xlu1 %359  ;;  %v314_v34 = vpop.xlane.xlu2 %313  ;;  %v588_v35 = vsel %vm587_vm9, %v1313_v7, %v584_v40  ;;  %v442_v38 = vmul.f32 0.5, %v441_v33  ;;  %vm605_vm1 = vweird.f32 %v1342_v53  ;;  %vm677_vm3 = vmor %vm675_vm13, %vm676_vm14 }
 0x131   :  { %v1374_v17 = vadd.f32 1e-12, %v360_v51  ;;  %v1376_v1 = vadd.f32 1e-12, %v314_v34  ;;  %v346_v60 = vpop.xlane.xlu0 %345  ;;  %v671_v8 = vmul.f32 %v1359_v47, %v670_v26  ;;  %v1381_v50 = vpop.eup %940  ;;  %v737_v14 = vmul.f32 %v588_v35, %v1121_v36 }
 0x132   :  { %v434_v61 = vmul.f32 %v1324_v13, %v433_v55  ;;  %v443_v37 = vsub.f32 1.5, %v442_v38  ;;  %v590_v12 = vmul.f32 %v1381_v50, %v1340_v52  ;;  %v1394_v30 = vpop.eup %942  ;;  %v1399_v23 = vadd.f32 1e-12, %v346_v60 }
 0x133   :  { %946 = vrsqrt.f32 %v1374_v17  ;;  %v672_v9 = vmul.f32 0.5, %v671_v8  ;;  %769 = vst [vmem:[#allocation2 + $0x90] sm:$0xff] %v737_v14  ;;  %v600_v31 = vmul.f32 %v1394_v30, %v1342_v53  ;;  %v1405_v3 = vpop.eup %944  ;;  %vm525_vm2 = vweird.f32 %v1354_v21 }
 0x134   :  { %v438_v7 = vsel %vm437_vm11, %v1324_v13, %v434_v61  ;;  %948 = vrsqrt.f32 %v1376_v1  ;;  %v444_v18 = vmul.f32 %v1349_v22, %v443_v37  ;;  %v591_v13 = vmul.f32 %v1381_v50, %v590_v12 }
 0x135   :  { %v722_v36 = vmul.f32 %v438_v7, %v1127_v39  ;;  %v673_v28 = vsub.f32 1.5, %v672_v9  ;;  %950 = vrsqrt.f32 %v1399_v23  ;;  %v601_v41 = vmul.f32 %v1394_v30, %v600_v31 }
 0x136   :  { %v448_v39 = vsel %vm447_vm15, %v1349_v22, %v444_v18  ;;  %v592_v25 = vmul.f32 0.5, %v591_v13  ;;  %vm596_vm4 = vweird.f32 %v1381_v50  ;;  %v520_v22 = vmul.f32 %v1405_v3, %v1354_v21 }
 0x137   :  { %754 = vst [vmem:[#allocation2 + $0x18] sm:$0xff] %v722_v36  ;;  %v674_v27 = vmul.f32 %v1359_v47, %v673_v28  ;;  %v723_v59 = vmul.f32 %v448_v39, %v1139_v45  ;;  %v602_v43 = vmul.f32 0.5, %v601_v41  ;;  %vm606_vm5 = vweird.f32 %v1394_v30  ;;  %vm597_vm6 = vmor %vm595_vm0, %vm596_vm4 }
 0x138   :  { %v330_v19 = vpop.xlane.xlu1 %329  ;;  %v332_v20 = vpop.xlane.xlu2 %331  ;;  %v593_v42 = vsub.f32 1.5, %v592_v25  ;;  %v521_v55 = vmul.f32 %v1405_v3, %v520_v22  ;;  %vm526_vm7 = vweird.f32 %v1405_v3  ;;  %vm685_vm8 = vweird.f32 %v1374_v17  ;;  %vm607_vm9 = vmor %vm605_vm1, %vm606_vm5 }
 0x139   :  { %v1418_v24 = vpop.eup %946  ;;  %v1428_v29 = vadd.f32 1e-12, %v330_v19  ;;  %v316_v16 = vpop.xlane.xlu0 %315  ;;  %v678_v32 = vsel %vm677_vm3, %v1359_v47, %v674_v27  ;;  %755 = vst [vmem:[#allocation2 + $0x20] sm:$0xff] %v723_v59  ;;  %v603_v26 = vsub.f32 1.5, %v602_v43  ;;  %v1451_v60 = vadd.f32 1e-12, %v332_v20  ;;  %vm527_vm12 = vmor %vm525_vm2, %vm526_vm7 }
 0x13a   :  { %v680_v45 = vmul.f32 %v1418_v24, %v1374_v17  ;;  %v1433_v40 = vpop.eup %948  ;;  %v746_v2 = vmul.f32 %v678_v32, %v1141_v46  ;;  %v594_v33 = vmul.f32 %v1381_v50, %v593_v42  ;;  %v522_v46 = vmul.f32 0.5, %v521_v55 }
 0x13b   :  { %952 = vrsqrt.f32 %v1428_v29  ;;  %v450_v51 = vmul.f32 %v1433_v40, %v1376_v1  ;;  %v1443_v34 = vpop.eup %950  ;;  %v604_v61 = vmul.f32 %v1394_v30, %v603_v26  ;;  %vm686_vm10 = vweird.f32 %v1418_v24 }
 0x13c   :  { %v681_v47 = vmul.f32 %v1418_v24, %v680_v45  ;;  %778 = vst [vmem:[#allocation2 + $0xd8] sm:$0xff] %v746_v2  ;;  %v598_v35 = vsel %vm597_vm6, %v1381_v50, %v594_v33  ;;  %v523_v52 = vsub.f32 1.5, %v522_v46  ;;  %v610_v7 = vmul.f32 %v1443_v34, %v1399_v23  ;;  %vm687_vm14 = vmor %vm685_vm8, %vm686_vm10 }
 0x13d   :  { %v451_v8 = vmul.f32 %v1433_v40, %v450_v51  ;;  %v738_v14 = vmul.f32 %v598_v35, %v1137_v44  ;;  %v608_v50 = vsel %vm607_vm9, %v1394_v30, %v604_v61  ;;  %954 = vrsqrt.f32 %v1451_v60 }
 0x13e   :  { %v682_v38 = vmul.f32 0.5, %v681_v47  ;;  %v739_v53 = vmul.f32 %v608_v50, %v1147_v49  ;;  %v524_v18 = vmul.f32 %v1405_v3, %v523_v52  ;;  %vm455_vm11 = vweird.f32 %v1376_v1 }
 0x13f   :  { %v452_v9 = vmul.f32 0.5, %v451_v8  ;;  %770 = vst [vmem:[#allocation2 + $0x98] sm:$0xff] %v738_v14  ;;  %v611_v28 = vmul.f32 %v1443_v34, %v610_v7  ;;  %vm456_vm13 = vweird.f32 %v1433_v40  ;;  %v1485_v25 = vadd.f32 1e-12, %v316_v16 }
 0x140   :  { %v683_v37 = vsub.f32 1.5, %v682_v38  ;;  %v348_v12 = vpop.xlane.xlu1 %347  ;;  %v350_v36 = vpop.xlane.xlu2 %349  ;;  %771 = vst [vmem:[#allocation2 + $0xa0] sm:$0xff] %v739_v53  ;;  %v528_v39 = vsel %vm527_vm12, %v1405_v3, %v524_v18  ;;  %vm457_vm15 = vmor %vm455_vm11, %vm456_vm13  ;;  %vm616_vm0 = vweird.f32 %v1443_v34  ;;  %vm615_vm1 = vweird.f32 %v1399_v23 }
 0x141   :  { %v1466_v44 = vpop.eup %952  ;;  %v334_v13 = vpop.xlane.xlu0 %333  ;;  %v453_v31 = vsub.f32 1.5, %v452_v9  ;;  %v612_v27 = vmul.f32 0.5, %v611_v28  ;;  %v1487_v21 = vadd.f32 1e-12, %v348_v12  ;;  %v731_v41 = vmul.f32 %v528_v39, %v1145_v48  ;;  %vm617_vm2 = vmor %vm615_vm1, %vm616_vm0 }
 0x142   :  { %v684_v30 = vmul.f32 %v1418_v24, %v683_v37  ;;  %v530_v49 = vmul.f32 %v1466_v44, %v1428_v29  ;;  %956 = vrsqrt.f32 %v1485_v25  ;;  %vm536_vm3 = vweird.f32 %v1466_v44 }
 0x143   :  { %v454_v20 = vmul.f32 %v1433_v40, %v453_v31  ;;  %v613_v17 = vsub.f32 1.5, %v612_v27  ;;  %v955_v22 = vpop.eup %954  ;;  %763 = vst [vmem:[#allocation2 + $0x60] sm:$0xff] %v731_v41  ;;  %958 = vrsqrt.f32 %v1487_v21  ;;  %v1505_v42 = vadd.f32 1e-12, %v350_v36 }
 0x144   :  { %v688_v19 = vsel %vm687_vm14, %v1418_v24, %v684_v30  ;;  %v531_v59 = vmul.f32 %v1466_v44, %v530_v49  ;;  %v540_v1 = vmul.f32 %v955_v22, %v1451_v60  ;;  %v1507_v43 = vadd.f32 1e-12, %v334_v13 }
 0x145   :  { %v747_v3 = vmul.f32 %v688_v19, %v1165_v58  ;;  %v458_v48 = vsel %vm457_vm15, %v1433_v40, %v454_v20  ;;  %v614_v58 = vmul.f32 %v1443_v34, %v613_v17  ;;  %vm535_vm4 = vweird.f32 %v1428_v29 }
 0x146   :  { %v532_v16 = vmul.f32 0.5, %v531_v59  ;;  %v724_v24 = vmul.f32 %v458_v48, %v1163_v57  ;;  %v541_v57 = vmul.f32 %v955_v22, %v540_v1  ;;  %960 = vrsqrt.f32 %v1505_v42  ;;  %vm537_vm5 = vmor %vm535_vm4, %vm536_vm3 }
 0x147   :  { %779 = vst [vmem:[#allocation2 + $0xe0] sm:$0xff] %v747_v3  ;;  %v618_v2 = vsel %vm617_vm2, %v1443_v34, %v614_v58  ;;  %962 = vrsqrt.f32 %v1507_v43  ;;  %vm545_vm6 = vweird.f32 %v1451_v60  ;;  %vm546_vm7 = vweird.f32 %v955_v22 }
 0x148   :  { %v533_v32 = vsub.f32 1.5, %v532_v16  ;;  %v362_v45 = vpop.xlane.xlu2 %361  ;;  %v318_v40 = vpop.xlane.xlu1 %317  ;;  %756 = vst [vmem:[#allocation2 + $0x28] sm:$0xff] %v724_v24  ;;  %v740_v23 = vmul.f32 %v618_v2, %v1157_v54  ;;  %v542_v51 = vmul.f32 0.5, %v541_v57  ;;  %vm547_vm8 = vmor %vm545_vm6, %vm546_vm7  ;;  %vm465_vm9 = vweird.f32 %v1485_v25 }
 0x149   :  { %v1511_v55 = vadd.f32 1e-12, %v362_v45  ;;  %v1516_v26 = vadd.f32 1e-12, %v318_v40  ;;  %v957_v47 = vpop.eup %956  ;;  %v364_v34 = vpop.xlane.xlu0 %363  ;;  %vm625_vm10 = vweird.f32 %v1487_v21  ;;  %vm635_vm1 = vweird.f32 %v1505_v42 }
 0x14a   :  { %v534_v33 = vmul.f32 %v1466_v44, %v533_v32  ;;  %v959_v29 = vpop.eup %958  ;;  %772 = vst [vmem:[#allocation2 + $0xa8] sm:$0xff] %v740_v23  ;;  %v460_v54 = vmul.f32 %v957_v47, %v1485_v25  ;;  %v543_v61 = vsub.f32 1.5, %v542_v51  ;;  %v1528_v14 = vadd.f32 1e-12, %v364_v34 }
 0x14b   :  { %964 = vrsqrt.f32 %v1511_v55  ;;  %v620_v38 = vmul.f32 %v959_v29, %v1487_v21  ;;  %vm466_vm11 = vweird.f32 %v957_v47  ;;  %vm626_vm12 = vweird.f32 %v959_v29 }
 0x14c   :  { %v538_v46 = vsel %vm537_vm5, %v1466_v44, %v534_v33  ;;  %v461_v8 = vmul.f32 %v957_v47, %v460_v54  ;;  %966 = vrsqrt.f32 %v1516_v26  ;;  %v544_v52 = vmul.f32 %v955_v22, %v543_v61  ;;  %v1530_v50 = vpop.eup %960  ;;  %vm467_vm14 = vmor %vm465_vm9, %vm466_vm11 }
 0x14d   :  { %v732_v35 = vmul.f32 %v538_v46, %v1161_v56  ;;  %v621_v7 = vmul.f32 %v959_v29, %v620_v38  ;;  %968 = vrsqrt.f32 %v1528_v14  ;;  %v1534_v56 = vpop.eup %962  ;;  %v630_v12 = vmul.f32 %v1530_v50, %v1505_v42  ;;  %vm627_vm15 = vmor %vm625_vm10, %vm626_vm12 }
 0x14e   :  { %v462_v60 = vmul.f32 0.5, %v461_v8  ;;  %v548_v37 = vsel %vm547_vm8, %v955_v22, %v544_v52  ;;  %v550_v28 = vmul.f32 %v1534_v56, %v1507_v43  ;;  %vm636_vm13 = vweird.f32 %v1530_v50 }
 0x14f   :  { %764 = vst [vmem:[#allocation2 + $0x68] sm:$0xff] %v732_v35  ;;  %v622_v9 = vmul.f32 0.5, %v621_v7  ;;  %v733_v53 = vmul.f32 %v548_v37, %v1175_v63  ;;  %v631_v30 = vmul.f32 %v1530_v50, %v630_v12  ;;  %vm556_vm0 = vweird.f32 %v1534_v56  ;;  %vm637_vm3 = vmor %vm635_vm1, %vm636_vm13 }
 0x150   :  { %v366_v36 = vpop.xlane.xlu1 %365  ;;  %v463_v18 = vsub.f32 1.5, %v462_v60  ;;  %v551_v27 = vmul.f32 %v1534_v56, %v550_v28  ;;  %vm555_vm4 = vweird.f32 %v1507_v43  ;;  %vm695_vm6 = vweird.f32 %v1511_v55 }
 0x151   :  { %v965_v44 = vpop.eup %964  ;;  %v623_v13 = vsub.f32 1.5, %v622_v9  ;;  %765 = vst [vmem:[#allocation2 + $0x70] sm:$0xff] %v733_v53  ;;  %v1548_v63 = vadd.f32 1e-12, %v366_v36  ;;  %v632_v19 = vmul.f32 0.5, %v631_v30  ;;  %vm557_vm5 = vmor %vm555_vm4, %vm556_vm0  ;;  %vm475_vm9 = vweird.f32 %v1516_v26 }
 0x152   :  { %v690_v31 = vmul.f32 %v965_v44, %v1511_v55  ;;  %v1544_v49 = vpop.eup %966  ;;  %v464_v39 = vmul.f32 %v957_v47, %v463_v18  ;;  %v552_v22 = vmul.f32 0.5, %v551_v27  ;;  %vm696_vm2 = vweird.f32 %v965_v44 }
 0x153   :  { %v624_v41 = vmul.f32 %v959_v29, %v623_v13  ;;  %v470_v59 = vmul.f32 %v1544_v49, %v1516_v26  ;;  %v969_v3 = vpop.eup %968  ;;  %970 = vrsqrt.f32 %v1548_v63  ;;  %v633_v16 = vsub.f32 1.5, %v632_v19  ;;  %vm697_vm8 = vmor %vm695_vm6, %vm696_vm2 }
 0x154   :  { %v691_v20 = vmul.f32 %v965_v44, %v690_v31  ;;  %v468_v17 = vsel %vm467_vm14, %v957_v47, %v464_v39  ;;  %v553_v1 = vsub.f32 1.5, %v552_v22  ;;  %v700_v45 = vmul.f32 %v969_v3, %v1528_v14 }
 0x155   :  { %v725_v25 = vmul.f32 %v468_v17, %v1177_v0  ;;  %v628_v48 = vsel %vm627_vm15, %v959_v29, %v624_v41  ;;  %v471_v32 = vmul.f32 %v1544_v49, %v470_v59  ;;  %v634_v21 = vmul.f32 %v1530_v50, %v633_v16 }
 0x156   :  { %v692_v24 = vmul.f32 0.5, %v691_v20  ;;  %v741_v58 = vmul.f32 %v628_v48, %v1173_v62  ;;  %v554_v0 = vmul.f32 %v1534_v56, %v553_v1  ;;  %v701_v2 = vmul.f32 %v969_v3, %v700_v45 }
 0x157   :  { %757 = vst [vmem:[#allocation2 + $0x30] sm:$0xff] %v725_v25  ;;  %v472_v62 = vmul.f32 0.5, %v471_v32  ;;  %v638_v57 = vsel %vm637_vm3, %v1530_v50, %v634_v21  ;;  %vm476_vm7 = vweird.f32 %v1544_v49  ;;  %vm706_vm10 = vweird.f32 %v969_v3 }
 0x158   :  { %v693_v40 = vsub.f32 1.5, %v692_v24  ;;  %773 = vst [vmem:[#allocation2 + $0xb0] sm:$0xff] %v741_v58  ;;  %v742_v33 = vmul.f32 %v638_v57, %v1187_v5  ;;  %v558_v47 = vsel %vm557_vm5, %v1534_v56, %v554_v0  ;;  %v702_v51 = vmul.f32 0.5, %v701_v2  ;;  %vm477_vm11 = vmor %vm475_vm9, %vm476_vm7 }
 0x159   :  { %v971_v42 = vpop.eup %970  ;;  %v473_v43 = vsub.f32 1.5, %v472_v62  ;;  %v734_v34 = vmul.f32 %v558_v47, %v1189_v6  ;;  %vm705_vm12 = vweird.f32 %v1528_v14  ;;  %vm715_vm15 = vweird.f32 %v1548_v63 }
 0x15a   :  { %v694_v23 = vmul.f32 %v965_v44, %v693_v40  ;;  %v710_v46 = vmul.f32 %v971_v42, %v1548_v63  ;;  %774 = vst [vmem:[#allocation2 + $0xb8] sm:$0xff] %v742_v33  ;;  %v703_v35 = vsub.f32 1.5, %v702_v51  ;;  %vm707_vm13 = vmor %vm705_vm12, %vm706_vm10  ;;  %vm716_vm14 = vweird.f32 %v971_v42 }
 0x15b   :  { %v474_v54 = vmul.f32 %v1544_v49, %v473_v43  ;;  %766 = vst [vmem:[#allocation2 + $0x78] sm:$0xff] %v734_v34  ;;  %vm717_vm0 = vmor %vm715_vm15, %vm716_vm14 }
 0x15c   :  { %v698_v29 = vsel %vm697_vm8, %v965_v44, %v694_v23  ;;  %v711_v5 = vmul.f32 %v971_v42, %v710_v46  ;;  %v704_v61 = vmul.f32 %v969_v3, %v703_v35 }
 0x15d   :  { %v748_v55 = vmul.f32 %v698_v29, %v1185_v4  ;;  %v478_v6 = vsel %vm477_vm11, %v1544_v49, %v474_v54 }
 0x15e   :  { %v726_v26 = vmul.f32 %v478_v6, %v1199_v11  ;;  %v712_v38 = vmul.f32 0.5, %v711_v5  ;;  %v708_v4 = vsel %vm707_vm13, %v969_v3, %v704_v61 }
 0x15f   :  { %780 = vst [vmem:[#allocation2 + $0xe8] sm:$0xff] %v748_v55  ;;  %v749_v8 = vmul.f32 %v708_v4, %v1197_v10 }
 0x160   :  { %758 = vst [vmem:[#allocation2 + $0x38] sm:$0xff] %v726_v26  ;;  %v713_v52 = vsub.f32 1.5, %v712_v38 }
 0x161   :  { %781 = vst [vmem:[#allocation2 + $0xf0] sm:$0xff] %v749_v8 }
 0x162   :  { %v714_v7 = vmul.f32 %v971_v42, %v713_v52 }
 0x164   :  { %v718_v11 = vsel %vm717_vm0, %v971_v42, %v714_v7 }
 0x165   :  { %v750_v14 = vmul.f32 %v718_v11, %v1207_v15 }
 0x167   :  { %782 = vst [vmem:[#allocation2 + $0xf8] sm:$0xff] %v750_v14 }
 0x168   :  { %795 = dma.vmem_to_hbm [thread:$0]  %s788_s14, 4096, %s790_s17, [#allocation3], %s999_s18, %s999_s18, %s1000_s1  }
 0x169   :  { %996 = dma.done.wait [#allocation3], 4096  }
 0x16a   :  { %997 = vsyncadd [#allocation3], 4294963200 }
 0x16b   :  { %800 = vsyncpa [#allocation3], 1 }

</bundles_post_ra>
